<compile_context>
chip_gen: v5e
topology: v5e:2x2
jax: 0.10.0
libtpu: 0.0.40
codegen_flags: <defaults>
</compile_context>

<pallas_src>
import functools
import math

import jax
import jax.numpy as jnp
from jax.experimental import pallas as pl
from jax.experimental.pallas import tpu as pltpu


_GELU_C = math.sqrt(2.0 / math.pi)


def _pick_tile(n, candidates):
    for c in candidates:
        if n % c == 0:
            return c
    return n


@functools.lru_cache(maxsize=None)
def _vmem_limit_bytes():
    """Generation-aware scoped-VMEM budget (generous on v5e/v6e 128 MiB, tighter on v7x 64 MiB)."""
    try:
        cap = int(pltpu.get_tpu_info().vmem_capacity_bytes)
        return max(32 * 1024 * 1024, min(cap * 3 // 4, 100 * 1024 * 1024))
    except Exception:
        return None   # fall back to the compiler default


# ----------------------------------------------------------------------------
# Fused attention sublayer kernel
#   (Q/K proj from behavior, V from LayerNorm(x), masked flash attention, Wo, +x)
# ----------------------------------------------------------------------------
def _attn_sublayer_kernel(mask_ref, x_ref, x0_ref, side_ref,
                          wq_ref, wqs_ref, bq_ref,
                          wk_ref, wks_ref, bk_ref,
                          wv_ref, bv_ref, wo_ref, bo_ref,
                          g_ref, beta_ref,
                          o_ref,
                          q_sc, m_sc, l_sc, acc_sc,
                          *, heads, scale, eps):
    ki = pl.program_id(1)
    nk = pl.num_programs(1)
    L, H = x_ref.shape[1], x_ref.shape[2]
    tk = mask_ref.shape[2]
    dk = H // heads
    bf16 = jnp.bfloat16

    # --- once per batch element: whole-width Q projection (cached bf16) + softmax state ---
    @pl.when(ki == 0)
    def _():
        x0 = x0_ref[0]                                             # [L, H] bf16
        side = side_ref[0]                                         # [L, 2] f32
        q = jnp.dot(x0, wq_ref[...], preferred_element_type=jnp.float32)
        q = (q + side[:, 0:1] * wqs_ref[0:1, :]
               + side[:, 1:2] * wqs_ref[1:2, :] + bq_ref[...])
        q_sc[...] = (q * scale).astype(bf16)                       # fold 1/sqrt(dk) into Q
        m_sc[...] = jnp.full((heads, L, 1), -jnp.inf, jnp.float32)
        l_sc[...] = jnp.zeros((heads, L, 1), jnp.float32)
        acc_sc[...] = jnp.zeros((L, H), jnp.float32)

    # --- this KV tile: slice the resident blocks (no second DMA of x / x0) ---
    kstart = pl.multiple_of(ki * tk, tk)
    x_kv = x_ref[0, pl.ds(kstart, tk), :]                          # [tk, H] f32 (V source)
    x0_kv = x0_ref[0, pl.ds(kstart, tk), :]                        # [tk, H] bf16 (K source)
    side_kv = side_ref[0, pl.ds(kstart, tk), :]                    # [tk, 2] f32

    # K = behavior @ Wk  (whole-width matmul + two rank-1 side-feature adds on the VPU)
    k = jnp.dot(x0_kv, wk_ref[...], preferred_element_type=jnp.float32)
    k = (k + side_kv[:, 0:1] * wks_ref[0:1, :]
           + side_kv[:, 1:2] * wks_ref[1:2, :] + bk_ref[...]).astype(bf16)

    # V = LayerNorm(x) @ Wv  (two-pass LN, unbiased variance, eps added to std)
    mean = jnp.mean(x_kv, axis=-1, keepdims=True)
    xc = x_kv - mean
    var = jnp.mean(xc * xc, axis=-1, keepdims=True) * (H / (H - 1.0))
    xn = (g_ref[...] * xc / (jnp.sqrt(var) + eps) + beta_ref[...]).astype(bf16)
    v = (jnp.dot(xn, wv_ref[...], preferred_element_type=jnp.float32)
         + bv_ref[...]).astype(bf16)                               # [tk, H]

    # key-mask additive bias, hoisted out of the head loop
    bias = jnp.where(mask_ref[0] == 0.0, -1e9, 0.0)                # [1, tk]

    q_all = q_sc[...]                                              # one dense [L, H] load
    acc_prev = acc_sc[...]                                         # one dense [L, H] load
    acc_new = []
    for h in range(heads):
        sl = slice(h * dk, (h + 1) * dk)
        s = jax.lax.dot_general(q_all[:, sl], k[:, sl], (((1,), (1,)), ((), ())),
                                preferred_element_type=jnp.float32) + bias   # [L, tk]
        m_prev = m_sc[h]
        m_new = jnp.maximum(m_prev, jnp.max(s, axis=-1, keepdims=True))
        alpha = jnp.exp(m_prev - m_new)
        p = jnp.exp(s - m_new)
        l_sc[h] = alpha * l_sc[h] + jnp.sum(p, axis=-1, keepdims=True)
        m_sc[h] = m_new
        pv = jnp.dot(p.astype(bf16), v[:, sl], preferred_element_type=jnp.float32)
        acc_new.append(alpha * acc_prev[:, sl] + pv)
    acc_sc[...] = jnp.concatenate(acc_new, axis=-1)                # one dense [L, H] store

    # --- epilogue: normalize, single [L,H] x [H,H] output projection, fused residual ---
    @pl.when(ki == nk - 1)
    def _():
        acc = acc_sc[...]
        ctx = jnp.concatenate(
            [acc[:, h * dk:(h + 1) * dk] * pl.reciprocal(l_sc[h], approx=True)
             for h in range(heads)], axis=-1).astype(bf16)
        out = (x_ref[0] + bo_ref[...]
               + jnp.dot(ctx, wo_ref[...], preferred_element_type=jnp.float32))
        o_ref[0] = out.astype(o_ref.dtype)


def attention_sublayer(x, x0_bf, side, mask3, blk, heads):
    """x: [B,L,H] f32 (residual / V source); x0_bf: [B,L,H] bf16 (behavior's embedding part);
    side: [B,L,2] f32 (overall, timeDiff); mask3: [B,1,L] f32 key mask."""
    B, L, H = x.shape
    dk = H // heads
    tk = _pick_tile(L, (512, 256, 128))     # KV tile; VMEM stays O(L*H + tk*H) per step
    scale = 1.0 / math.sqrt(dk)

    def rep2(shape):
        return pl.BlockSpec(shape, lambda b, ki: (0, 0))

    return pl.pallas_call(
        functools.partial(_attn_sublayer_kernel, heads=heads, scale=scale, eps=1e-6),
        out_shape=jax.ShapeDtypeStruct((B, L, H), jnp.float32),
        grid=(B, L // tk),
        in_specs=[
            pl.BlockSpec((1, 1, tk), lambda b, ki: (b, 0, ki)),   # key-mask tile
            pl.BlockSpec((1, L, H), lambda b, ki: (b, 0, 0)),     # x (residual / V source)
            pl.BlockSpec((1, L, H), lambda b, ki: (b, 0, 0)),     # x0 bf16 (Q/K source)
            pl.BlockSpec((1, L, 2), lambda b, ki: (b, 0, 0)),     # overall / timeDiff
            rep2((H, H)), rep2((2, H)), rep2((1, H)),             # wq, wq_side, bq
            rep2((H, H)), rep2((2, H)), rep2((1, H)),             # wk, wk_side, bk
            rep2((H, H)), rep2((1, H)),                           # wv, bv
            rep2((H, H)), rep2((1, H)),                           # wo, bo
            rep2((1, H)), rep2((1, H)),                           # ln1 gamma / beta
        ],
        out_specs=pl.BlockSpec((1, L, H), lambda b, ki: (b, 0, 0)),
        scratch_shapes=[
            pltpu.VMEM((L, H), jnp.bfloat16),          # cached, pre-scaled Q (lane-dense)
            pltpu.VMEM((heads, L, 1), jnp.float32),    # running max (per head, tiny)
            pltpu.VMEM((heads, L, 1), jnp.float32),    # running denom (per head, tiny)
            pltpu.VMEM((L, H), jnp.float32),           # running numerator (heads in lanes)
        ],
        compiler_params=pltpu.CompilerParams(
            dimension_semantics=("parallel", "arbitrary"),
            vmem_limit_bytes=_vmem_limit_bytes()),
    )(mask3, x, x0_bf, side,
      blk["wq"], blk["wq_side"], blk["bq"],
      blk["wk"], blk["wk_side"], blk["bk"],
      blk["wv"], blk["bv"], blk["wo"], blk["bo"],
      blk["ln1_g"], blk["ln1_b"])


# ----------------------------------------------------------------------------
# Fused FFN sublayer kernel (LN -> W1 -> gelu -> W2 -> +x), rows x dff-chunks
# ----------------------------------------------------------------------------
def _ffn_sublayer_kernel(x_ref, g_ref, beta_ref, w1_ref, b1_ref, w2_ref, b2_ref,
                         o_ref, xn_sc, acc_sc, *, eps):
    j = pl.program_id(1)
    nj = pl.num_programs(1)
    x = x_ref[...]                                             # [tm, H] f32
    H = x.shape[-1]

    @pl.when(j == 0)
    def _():
        mean = jnp.mean(x, axis=-1, keepdims=True)
        xc = x - mean
        var = jnp.mean(xc * xc, axis=-1, keepdims=True) * (H / (H - 1.0))
        xn_sc[...] = (g_ref[...] * xc / (jnp.sqrt(var) + eps)
                      + beta_ref[...]).astype(jnp.bfloat16)
        acc_sc[...] = x + b2_ref[...]            # residual + W2 bias; chunks accumulate below

    h1 = (jnp.dot(xn_sc[...], w1_ref[...], preferred_element_type=jnp.float32)
          + b1_ref[...])                                       # [tm, tdff]
    h1 = 0.5 * h1 * (1.0 + jnp.tanh(_GELU_C * (h1 + 0.044715 * (h1 * h1 * h1))))
    acc_sc[...] += jnp.dot(h1.astype(jnp.bfloat16), w2_ref[...],
                           preferred_element_type=jnp.float32)

    @pl.when(j == nj - 1)
    def _():
        o_ref[...] = acc_sc[...].astype(o_ref.dtype)


def _pick_dff_tile(H, dff):
    # Whole-dff weight blocks when W1+W2 (bf16, double-buffered ~ 8*H*dff bytes) stay small
    # (always the case on v5e/v6e for realistic H); otherwise tile dff (bounds VMEM on v7x).
    if 8 * H * dff <= 12 * 1024 * 1024:
        return dff
    return _pick_tile(dff, (2048, 1024, 512, 256, 128))


def ffn_sublayer(x, blk):
    B, L, H = x.shape
    N = B * L
    x2 = x.reshape(N, H)
    dff = blk["w1"].shape[1]
    tm = _pick_tile(N, (512, 256, 128, 64, 32, 16, 8))
    tdff = _pick_dff_tile(H, dff)
    out = pl.pallas_call(
        functools.partial(_ffn_sublayer_kernel, eps=1e-6),
        out_shape=jax.ShapeDtypeStruct((N, H), jnp.float32),
        grid=(N // tm, dff // tdff),
        in_specs=[
            pl.BlockSpec((tm, H), lambda i, j: (i, 0)),
            pl.BlockSpec((1, H), lambda i, j: (0, 0)),
            pl.BlockSpec((1, H), lambda i, j: (0, 0)),
            pl.BlockSpec((H, tdff), lambda i, j: (0, j)),
            pl.BlockSpec((1, tdff), lambda i, j: (0, j)),
            pl.BlockSpec((tdff, H), lambda i, j: (j, 0)),
            pl.BlockSpec((1, H), lambda i, j: (0, 0)),
        ],
        out_specs=pl.BlockSpec((tm, H), lambda i, j: (i, 0)),
        scratch_shapes=[
            pltpu.VMEM((tm, H), jnp.bfloat16),   # LayerNorm(x) cached across dff chunks
            pltpu.VMEM((tm, H), jnp.float32),    # residual + FFN accumulator
        ],
        compiler_params=pltpu.CompilerParams(
            dimension_semantics=("parallel", "arbitrary"),
            vmem_limit_bytes=_vmem_limit_bytes()),
    )(x2, blk["ln2_g"], blk["ln2_b"], blk["w1"], blk["b1"], blk["w2"], blk["b2"])
    return out.reshape(B, L, H)


# ----------------------------------------------------------------------------
# Parameters (deterministic in-script init; mirrors the nn.Module shapes)
# ----------------------------------------------------------------------------
def init_params(key, vocab_size, max_len, hidden, heads, n_layers):
    def nrm(k, shape, std=0.02):
        return std * jax.random.normal(k, shape, jnp.float32)

    keys = jax.random.split(key, 2 + 6 * n_layers)
    tok_emb = nrm(keys[0], (vocab_size, hidden)).at[0].set(0.0)  # padding_idx=0
    pos_emb = nrm(keys[1], (max_len, hidden))

    blocks = []
    ki = 2
    for _ in range(n_layers):
        blk = {
            # NOVA fusion: Q,K projections consume behavior_embed (hidden + 2 side dims)
            "wq": nrm(keys[ki + 0], (hidden + 2, hidden)), "bq": jnp.zeros((hidden,), jnp.float32),
            "wk": nrm(keys[ki + 1], (hidden + 2, hidden)), "bk": jnp.zeros((hidden,), jnp.float32),
            "wv": nrm(keys[ki + 2], (hidden, hidden)),     "bv": jnp.zeros((hidden,), jnp.float32),
            "wo": nrm(keys[ki + 3], (hidden, hidden)),     "bo": jnp.zeros((hidden,), jnp.float32),
            "ln1_g": jnp.ones((hidden,), jnp.float32), "ln1_b": jnp.zeros((hidden,), jnp.float32),
            "ln2_g": jnp.ones((hidden,), jnp.float32), "ln2_b": jnp.zeros((hidden,), jnp.float32),
            "w1": nrm(keys[ki + 4], (hidden, 4 * hidden)), "b1": jnp.zeros((4 * hidden,), jnp.float32),
            "w2": nrm(keys[ki + 5], (4 * hidden, hidden)), "b2": jnp.zeros((hidden,), jnp.float32),
        }
        blocks.append(blk)
        ki += 6
    return {"tok_emb": tok_emb, "pos_emb": pos_emb, "blocks": blocks}


def prepare_params(params):
    """One-time (hoisted out of the forward trace) kernel-layout weight prep:
    split behavior-projection rows (embedding part vs. overall/timeDiff rows), cast matmul
    weights to bf16, reshape biases / LN params to [1, dim]."""
    H = params["tok_emb"].shape[1]
    bf16 = jnp.bfloat16
    blocks = []
    for blk in params["blocks"]:
        blocks.append({
            "wq": blk["wq"][:H].astype(bf16),  "wq_side": blk["wq"][H:H + 2],
            "bq": blk["bq"].reshape(1, H),
            "wk": blk["wk"][:H].astype(bf16),  "wk_side": blk["wk"][H:H + 2],
            "bk": blk["bk"].reshape(1, H),
            "wv": blk["wv"].astype(bf16),      "bv": blk["bv"].reshape(1, H),
            "wo": blk["wo"].astype(bf16),      "bo": blk["bo"].reshape(1, H),
            "ln1_g": blk["ln1_g"].reshape(1, H), "ln1_b": blk["ln1_b"].reshape(1, H),
            "ln2_g": blk["ln2_g"].reshape(1, H), "ln2_b": blk["ln2_b"].reshape(1, H),
            "w1": blk["w1"].astype(bf16), "b1": blk["b1"].reshape(1, -1),
            "w2": blk["w2"].astype(bf16), "b2": blk["b2"].reshape(1, -1),
        })
    return {"tok_emb": params["tok_emb"], "pos_emb": params["pos_emb"], "blocks": blocks}


# ----------------------------------------------------------------------------
# Forward pass
# ----------------------------------------------------------------------------
def bert_forward(params, x_ids, overall, time_diff, heads):
    B, L = x_ids.shape
    H = params["tok_emb"].shape[1]

    # raw_mask = ones(B, L); raw_mask[:, -1] = 0.  The [B,1,L,L] broadcast of the original
    # is never materialized; the kernel applies the key mask in-VMEM.
    raw_mask = jnp.ones((B, L), jnp.float32).at[:, -1].set(0.0)
    mask3 = raw_mask[:, None, :]                       # [B, 1, L]

    # BERTEmbedding: token-embedding gather + positional embedding (plain JAX glue)
    x = params["tok_emb"][x_ids] + params["pos_emb"][None, :L, :]

    # behavior_embed = [x | overall | timeDiff] is handled in-kernel: x0 (bf16) drives the
    # whole-width part of the Q/K projections, the two side features become rank-1 VPU adds.
    x0_bf = x.astype(jnp.bfloat16)                                     # fixed across layers
    side = jnp.stack([overall, time_diff], axis=-1).astype(jnp.float32)   # [B, L, 2]

    for blk in params["blocks"]:
        x = attention_sublayer(x, x0_bf, side, mask3, blk, heads)   # LN/QKV/attn/Wo/+x fused
        x = ffn_sublayer(x, blk)                                    # LN/W1/gelu/W2/+x fused
    return x, raw_mask


# ----------------------------------------------------------------------------
if __name__ == "__main__":
    # small config consistent with the module's __init__
    B, L = 2, 8            # batch, bert_max_len
    HIDDEN = 32            # bert_hidden_units
    HEADS = 2              # bert_num_heads
    N_LAYERS = 2           # bert_num_blocks
    VOCAB = 50             # num_items

    key = jax.random.PRNGKey(0)
    k_par, k_ids, k_ov, k_td = jax.random.split(key, 4)

    raw_params = init_params(k_par, VOCAB, L, HIDDEN, HEADS, N_LAYERS)
    params = prepare_params(raw_params)   # weight layout prep hoisted out of the forward

    x_ids = jax.random.randint(k_ids, (B, L), 0, VOCAB)
    overall = jax.random.uniform(k_ov, (B, L), jnp.float32)
    time_diff = jax.random.uniform(k_td, (B, L), jnp.float32)

    fwd = jax.jit(bert_forward, static_argnames=("heads",))
    out, raw_mask = fwd(params, x_ids, overall, time_diff, heads=HEADS)
    out = jax.block_until_ready(out)
    raw_mask = jax.block_until_ready(raw_mask)

    assert out.shape == (B, L, HIDDEN)
    assert raw_mask.shape == (B, L)
    assert bool(jnp.all(jnp.isfinite(out)))
    print("KERNEL_OK")
</pallas_src>

<mosaic_0001>
module attributes {stable_mosaic.version = 11 : i64} {
  func.func @_ffn_sublayer_kernel(%arg0: i32, %arg1: i32, %arg2: memref<16x32xf32, #tpu.memory_space<vmem>>, %arg3: memref<1x32xf32, #tpu.memory_space<vmem>>, %arg4: memref<1x32xf32, #tpu.memory_space<vmem>>, %arg5: memref<32x128xbf16, #tpu.memory_space<vmem>>, %arg6: memref<1x128xf32, #tpu.memory_space<vmem>>, %arg7: memref<128x32xbf16, #tpu.memory_space<vmem>>, %arg8: memref<1x32xf32, #tpu.memory_space<vmem>>, %arg9: memref<16x32xf32, #tpu.memory_space<vmem>>, %arg10: memref<16x32xbf16, #tpu.memory_space<vmem>>, %arg11: memref<16x32xf32, #tpu.memory_space<vmem>>) attributes {dimension_semantics = [#tpu.dimension_semantics<parallel>, #tpu.dimension_semantics<arbitrary>], iteration_bounds = array<i64: 1, 1>, scalar_prefetch = 0 : i64, scratch_operands = 2 : i64, tpu.core_type = #tpu.core_type<tc>, window_params = [{transform_indices = @transform_0, window_bounds = array<i64: 16, 32>}, {pipeline_mode = #tpu.pipeline_mode<synchronous>, transform_indices = @transform_1, window_bounds = array<i64: 1, 32>}, {pipeline_mode = #tpu.pipeline_mode<synchronous>, transform_indices = @transform_2, window_bounds = array<i64: 1, 32>}, {transform_indices = @transform_3, window_bounds = array<i64: 32, 128>}, {transform_indices = @transform_4, window_bounds = array<i64: 1, 128>}, {transform_indices = @transform_5, window_bounds = array<i64: 128, 32>}, {pipeline_mode = #tpu.pipeline_mode<synchronous>, transform_indices = @transform_6, window_bounds = array<i64: 1, 32>}, {transform_indices = @transform_7, window_bounds = array<i64: 16, 32>}]} {
    %c0 = arith.constant 0 : index
    %c0_0 = arith.constant 0 : index
    %0 = vector.load %arg2[%c0, %c0_0] : memref<16x32xf32, #tpu.memory_space<vmem>>, vector<16x32xf32>
    %c0_i32 = arith.constant 0 : i32
    %1 = arith.cmpi eq, %arg1, %c0_i32 : i32
    %2 = arith.extui %1 : i1 to i32
    %c0_i32_1 = arith.constant 0 : i32
    %3 = arith.cmpi ne, %2, %c0_i32_1 : i32
    scf.if %3 {
      %cst_21 = arith.constant dense<0.000000e+00> : vector<16xf32>
      %32 = vector.multi_reduction <add>, %0, %cst_21 [1] : vector<16x32xf32> to vector<16xf32>
      %33 = vector.shape_cast %32 : vector<16xf32> to vector<16x1xf32>
      %cst_22 = arith.constant 3.200000e+01 : f32
      %34 = vector.broadcast %cst_22 : f32 to vector<16x1xf32>
      %35 = arith.divf %33, %34 : vector<16x1xf32>
      %36 = vector.broadcast %35 : vector<16x1xf32> to vector<16x32xf32>
      %37 = arith.subf %0, %36 : vector<16x32xf32>
      %38 = arith.mulf %37, %37 : vector<16x32xf32>
      %cst_23 = arith.constant dense<0.000000e+00> : vector<16xf32>
      %39 = vector.multi_reduction <add>, %38, %cst_23 [1] : vector<16x32xf32> to vector<16xf32>
      %40 = vector.shape_cast %39 : vector<16xf32> to vector<16x1xf32>
      %cst_24 = arith.constant 3.200000e+01 : f32
      %41 = vector.broadcast %cst_24 : f32 to vector<16x1xf32>
      %42 = arith.divf %40, %41 : vector<16x1xf32>
      %cst_25 = arith.constant 1.03225803 : f32
      %43 = vector.broadcast %cst_25 : f32 to vector<16x1xf32>
      %44 = arith.mulf %42, %43 : vector<16x1xf32>
      %c0_26 = arith.constant 0 : index
      %c0_27 = arith.constant 0 : index
      %45 = vector.load %arg3[%c0_26, %c0_27] : memref<1x32xf32, #tpu.memory_space<vmem>>, vector<1x32xf32>
      %46 = vector.broadcast %45 : vector<1x32xf32> to vector<16x32xf32>
      %47 = arith.mulf %46, %37 : vector<16x32xf32>
      %48 = math.sqrt %44 : vector<16x1xf32>
      %cst_28 = arith.constant 9.99999997E-7 : f32
      %49 = vector.broadcast %cst_28 : f32 to vector<16x1xf32>
      %50 = arith.addf %48, %49 : vector<16x1xf32>
      %51 = vector.broadcast %50 : vector<16x1xf32> to vector<16x32xf32>
      %52 = arith.divf %47, %51 : vector<16x32xf32>
      %c0_29 = arith.constant 0 : index
      %c0_30 = arith.constant 0 : index
      %53 = vector.load %arg4[%c0_29, %c0_30] : memref<1x32xf32, #tpu.memory_space<vmem>>, vector<1x32xf32>
      %54 = vector.broadcast %53 : vector<1x32xf32> to vector<16x32xf32>
      %55 = arith.addf %52, %54 : vector<16x32xf32>
      %56 = arith.truncf %55 : vector<16x32xf32> to vector<16x32xbf16>
      %c0_31 = arith.constant 0 : index
      %c0_32 = arith.constant 0 : index
      %57 = vector.load %arg10[%c0_31, %c0_32] : memref<16x32xbf16, #tpu.memory_space<vmem>>, vector<16x32xbf16>
      tpu.vector_store %arg10[%c0_31, %c0_32], %56 {strides = array<i32>} : memref<16x32xbf16, #tpu.memory_space<vmem>>, vector<16x32xbf16>,
      %c0_33 = arith.constant 0 : index
      %c0_34 = arith.constant 0 : index
      %58 = vector.load %arg8[%c0_33, %c0_34] : memref<1x32xf32, #tpu.memory_space<vmem>>, vector<1x32xf32>
      %59 = vector.broadcast %58 : vector<1x32xf32> to vector<16x32xf32>
      %60 = arith.addf %0, %59 : vector<16x32xf32>
      %c0_35 = arith.constant 0 : index
      %c0_36 = arith.constant 0 : index
      %61 = vector.load %arg11[%c0_35, %c0_36] : memref<16x32xf32, #tpu.memory_space<vmem>>, vector<16x32xf32>
      tpu.vector_store %arg11[%c0_35, %c0_36], %60 {strides = array<i32>} : memref<16x32xf32, #tpu.memory_space<vmem>>, vector<16x32xf32>,
    } else {
    }
    %c0_2 = arith.constant 0 : index
    %c0_3 = arith.constant 0 : index
    %4 = vector.load %arg10[%c0_2, %c0_3] : memref<16x32xbf16, #tpu.memory_space<vmem>>, vector<16x32xbf16>
    %c0_4 = arith.constant 0 : index
    %c0_5 = arith.constant 0 : index
    %5 = vector.load %arg5[%c0_4, %c0_5] : memref<32x128xbf16, #tpu.memory_space<vmem>>, vector<32x128xbf16>
    %cst = arith.constant dense<0.000000e+00> : vector<16x128xf32>
    %6 = tpu.matmul %4, %5, %cst {dimension_numbers = #tpu.dot_dimension_numbers<[1], [0], [0], [1], [0, 0, 1, 1], [], []>} : vector<16x32xbf16>, vector<32x128xbf16>, vector<16x128xf32> -> vector<16x128xf32>
    %c0_6 = arith.constant 0 : index
    %c0_7 = arith.constant 0 : index
    %7 = vector.load %arg6[%c0_6, %c0_7] : memref<1x128xf32, #tpu.memory_space<vmem>>, vector<1x128xf32>
    %8 = vector.broadcast %7 : vector<1x128xf32> to vector<16x128xf32>
    %9 = arith.addf %6, %8 : vector<16x128xf32>
    %cst_8 = arith.constant 5.000000e-01 : f32
    %10 = vector.broadcast %cst_8 : f32 to vector<16x128xf32>
    %11 = arith.mulf %10, %9 : vector<16x128xf32>
    %12 = arith.mulf %9, %9 : vector<16x128xf32>
    %13 = arith.mulf %12, %9 : vector<16x128xf32>
    %cst_9 = arith.constant 4.471500e-02 : f32
    %14 = vector.broadcast %cst_9 : f32 to vector<16x128xf32>
    %15 = arith.mulf %14, %13 : vector<16x128xf32>
    %16 = arith.addf %9, %15 : vector<16x128xf32>
    %cst_10 = arith.constant 0.797884583 : f32
    %17 = vector.broadcast %cst_10 : f32 to vector<16x128xf32>
    %18 = arith.mulf %17, %16 : vector<16x128xf32>
    %19 = math.tanh %18 : vector<16x128xf32>
    %cst_11 = arith.constant 1.000000e+00 : f32
    %20 = vector.broadcast %cst_11 : f32 to vector<16x128xf32>
    %21 = arith.addf %20, %19 : vector<16x128xf32>
    %22 = arith.mulf %11, %21 : vector<16x128xf32>
    %c0_12 = arith.constant 0 : index
    %c0_13 = arith.constant 0 : index
    %23 = vector.load %arg11[%c0_12, %c0_13] : memref<16x32xf32, #tpu.memory_space<vmem>>, vector<16x32xf32>
    %24 = arith.truncf %22 : vector<16x128xf32> to vector<16x128xbf16>
    %c0_14 = arith.constant 0 : index
    %c0_15 = arith.constant 0 : index
    %25 = vector.load %arg7[%c0_14, %c0_15] : memref<128x32xbf16, #tpu.memory_space<vmem>>, vector<128x32xbf16>
    %cst_16 = arith.constant dense<0.000000e+00> : vector<16x32xf32>
    %26 = tpu.matmul %24, %25, %cst_16 {dimension_numbers = #tpu.dot_dimension_numbers<[1], [0], [0], [1], [0, 0, 1, 1], [], []>} : vector<16x128xbf16>, vector<128x32xbf16>, vector<16x32xf32> -> vector<16x32xf32>
    %27 = arith.addf %23, %26 : vector<16x32xf32>
    %c0_17 = arith.constant 0 : index
    %c0_18 = arith.constant 0 : index
    %28 = vector.load %arg11[%c0_17, %c0_18] : memref<16x32xf32, #tpu.memory_space<vmem>>, vector<16x32xf32>
    tpu.vector_store %arg11[%c0_17, %c0_18], %27 {strides = array<i32>} : memref<16x32xf32, #tpu.memory_space<vmem>>, vector<16x32xf32>,
    %c0_i32_19 = arith.constant 0 : i32
    %29 = arith.cmpi eq, %arg1, %c0_i32_19 : i32
    %30 = arith.extui %29 : i1 to i32
    %c0_i32_20 = arith.constant 0 : i32
    %31 = arith.cmpi ne, %30, %c0_i32_20 : i32
    scf.if %31 {
      %c0_21 = arith.constant 0 : index
      %c0_22 = arith.constant 0 : index
      %32 = vector.load %arg11[%c0_21, %c0_22] : memref<16x32xf32, #tpu.memory_space<vmem>>, vector<16x32xf32>
      %c0_23 = arith.constant 0 : index
      %c0_24 = arith.constant 0 : index
      %33 = vector.load %arg9[%c0_23, %c0_24] : memref<16x32xf32, #tpu.memory_space<vmem>>, vector<16x32xf32>
      tpu.vector_store %arg9[%c0_23, %c0_24], %32 {strides = array<i32>} : memref<16x32xf32, #tpu.memory_space<vmem>>, vector<16x32xf32>,
    } else {
    }
    return
  }
  func.func @transform_0(%arg0: i32, %arg1: i32) -> (i32, i32) {
    %c0_i32 = arith.constant 0 : i32
    %c0_i32_0 = arith.constant 0 : i32
    return %arg0, %c0_i32 : i32, i32
  }
  func.func @transform_1(%arg0: i32, %arg1: i32) -> (i32, i32) {
    %c0_i32 = arith.constant 0 : i32
    %c0_i32_0 = arith.constant 0 : i32
    %c0_i32_1 = arith.constant 0 : i32
    return %c0_i32, %c0_i32_0 : i32, i32
  }
  func.func @transform_2(%arg0: i32, %arg1: i32) -> (i32, i32) {
    %c0_i32 = arith.constant 0 : i32
    %c0_i32_0 = arith.constant 0 : i32
    %c0_i32_1 = arith.constant 0 : i32
    return %c0_i32, %c0_i32_0 : i32, i32
  }
  func.func @transform_3(%arg0: i32, %arg1: i32) -> (i32, i32) {
    %c0_i32 = arith.constant 0 : i32
    %c0_i32_0 = arith.constant 0 : i32
    return %c0_i32, %arg1 : i32, i32
  }
  func.func @transform_4(%arg0: i32, %arg1: i32) -> (i32, i32) {
    %c0_i32 = arith.constant 0 : i32
    %c0_i32_0 = arith.constant 0 : i32
    return %c0_i32, %arg1 : i32, i32
  }
  func.func @transform_5(%arg0: i32, %arg1: i32) -> (i32, i32) {
    %c0_i32 = arith.constant 0 : i32
    %c0_i32_0 = arith.constant 0 : i32
    return %arg1, %c0_i32 : i32, i32
  }
  func.func @transform_6(%arg0: i32, %arg1: i32) -> (i32, i32) {
    %c0_i32 = arith.constant 0 : i32
    %c0_i32_0 = arith.constant 0 : i32
    %c0_i32_1 = arith.constant 0 : i32
    return %c0_i32, %c0_i32_0 : i32, i32
  }
  func.func @transform_7(%arg0: i32, %arg1: i32) -> (i32, i32) {
    %c0_i32 = arith.constant 0 : i32
    %c0_i32_0 = arith.constant 0 : i32
    return %arg0, %c0_i32 : i32, i32
  }
}

module attributes {stable_mosaic.version = 11 : i64} {
  func.func @_ffn_sublayer_kernel(%arg0: i32, %arg1: i32, %arg2: memref<16x32xf32, #tpu.memory_space<vmem>>, %arg3: memref<1x32xf32, #tpu.memory_space<vmem>>, %arg4: memref<1x32xf32, #tpu.memory_space<vmem>>, %arg5: memref<32x128xbf16, #tpu.memory_space<vmem>>, %arg6: memref<1x128xf32, #tpu.memory_space<vmem>>, %arg7: memref<128x32xbf16, #tpu.memory_space<vmem>>, %arg8: memref<1x32xf32, #tpu.memory_space<vmem>>, %arg9: memref<16x32xf32, #tpu.memory_space<vmem>>, %arg10: memref<16x32xbf16, #tpu.memory_space<vmem>>, %arg11: memref<16x32xf32, #tpu.memory_space<vmem>>) attributes {dimension_semantics = [#tpu.dimension_semantics<parallel>, #tpu.dimension_semantics<arbitrary>], iteration_bounds = array<i64: 1, 1>, scalar_prefetch = 0 : i64, scratch_operands = 2 : i64, tpu.core_type = #tpu.core_type<tc>, window_params = [{transform_indices = @transform_0, window_bounds = array<i64: 16, 32>}, {pipeline_mode = #tpu.pipeline_mode<synchronous>, transform_indices = @transform_1, window_bounds = array<i64: 1, 32>}, {pipeline_mode = #tpu.pipeline_mode<synchronous>, transform_indices = @transform_2, window_bounds = array<i64: 1, 32>}, {transform_indices = @transform_3, window_bounds = array<i64: 32, 128>}, {transform_indices = @transform_4, window_bounds = array<i64: 1, 128>}, {transform_indices = @transform_5, window_bounds = array<i64: 128, 32>}, {pipeline_mode = #tpu.pipeline_mode<synchronous>, transform_indices = @transform_6, window_bounds = array<i64: 1, 32>}, {transform_indices = @transform_7, window_bounds = array<i64: 16, 32>}]} {
    %c0 = arith.constant 0 : index
    %c0_0 = arith.constant 0 : index
    %0 = vector.load %arg2[%c0, %c0_0] : memref<16x32xf32, #tpu.memory_space<vmem>>, vector<16x32xf32>
    %c0_i32 = arith.constant 0 : i32
    %1 = arith.cmpi eq, %arg1, %c0_i32 : i32
    %2 = arith.extui %1 : i1 to i32
    %c0_i32_1 = arith.constant 0 : i32
    %3 = arith.cmpi ne, %2, %c0_i32_1 : i32
    scf.if %3 {
      %cst_21 = arith.constant dense<0.000000e+00> : vector<16xf32>
      %32 = vector.multi_reduction <add>, %0, %cst_21 [1] : vector<16x32xf32> to vector<16xf32>
      %33 = vector.shape_cast %32 : vector<16xf32> to vector<16x1xf32>
      %cst_22 = arith.constant 3.200000e+01 : f32
      %34 = vector.broadcast %cst_22 : f32 to vector<16x1xf32>
      %35 = arith.divf %33, %34 : vector<16x1xf32>
      %36 = vector.broadcast %35 : vector<16x1xf32> to vector<16x32xf32>
      %37 = arith.subf %0, %36 : vector<16x32xf32>
      %38 = arith.mulf %37, %37 : vector<16x32xf32>
      %cst_23 = arith.constant dense<0.000000e+00> : vector<16xf32>
      %39 = vector.multi_reduction <add>, %38, %cst_23 [1] : vector<16x32xf32> to vector<16xf32>
      %40 = vector.shape_cast %39 : vector<16xf32> to vector<16x1xf32>
      %cst_24 = arith.constant 3.200000e+01 : f32
      %41 = vector.broadcast %cst_24 : f32 to vector<16x1xf32>
      %42 = arith.divf %40, %41 : vector<16x1xf32>
      %cst_25 = arith.constant 1.03225803 : f32
      %43 = vector.broadcast %cst_25 : f32 to vector<16x1xf32>
      %44 = arith.mulf %42, %43 : vector<16x1xf32>
      %c0_26 = arith.constant 0 : index
      %c0_27 = arith.constant 0 : index
      %45 = vector.load %arg3[%c0_26, %c0_27] : memref<1x32xf32, #tpu.memory_space<vmem>>, vector<1x32xf32>
      %46 = vector.broadcast %45 : vector<1x32xf32> to vector<16x32xf32>
      %47 = arith.mulf %46, %37 : vector<16x32xf32>
      %48 = math.sqrt %44 : vector<16x1xf32>
      %cst_28 = arith.constant 9.99999997E-7 : f32
      %49 = vector.broadcast %cst_28 : f32 to vector<16x1xf32>
      %50 = arith.addf %48, %49 : vector<16x1xf32>
      %51 = vector.broadcast %50 : vector<16x1xf32> to vector<16x32xf32>
      %52 = arith.divf %47, %51 : vector<16x32xf32>
      %c0_29 = arith.constant 0 : index
      %c0_30 = arith.constant 0 : index
      %53 = vector.load %arg4[%c0_29, %c0_30] : memref<1x32xf32, #tpu.memory_space<vmem>>, vector<1x32xf32>
      %54 = vector.broadcast %53 : vector<1x32xf32> to vector<16x32xf32>
      %55 = arith.addf %52, %54 : vector<16x32xf32>
      %56 = arith.truncf %55 : vector<16x32xf32> to vector<16x32xbf16>
      %c0_31 = arith.constant 0 : index
      %c0_32 = arith.constant 0 : index
      %57 = vector.load %arg10[%c0_31, %c0_32] : memref<16x32xbf16, #tpu.memory_space<vmem>>, vector<16x32xbf16>
      tpu.vector_store %arg10[%c0_31, %c0_32], %56 {strides = array<i32>} : memref<16x32xbf16, #tpu.memory_space<vmem>>, vector<16x32xbf16>,
      %c0_33 = arith.constant 0 : index
      %c0_34 = arith.constant 0 : index
      %58 = vector.load %arg8[%c0_33, %c0_34] : memref<1x32xf32, #tpu.memory_space<vmem>>, vector<1x32xf32>
      %59 = vector.broadcast %58 : vector<1x32xf32> to vector<16x32xf32>
      %60 = arith.addf %0, %59 : vector<16x32xf32>
      %c0_35 = arith.constant 0 : index
      %c0_36 = arith.constant 0 : index
      %61 = vector.load %arg11[%c0_35, %c0_36] : memref<16x32xf32, #tpu.memory_space<vmem>>, vector<16x32xf32>
      tpu.vector_store %arg11[%c0_35, %c0_36], %60 {strides = array<i32>} : memref<16x32xf32, #tpu.memory_space<vmem>>, vector<16x32xf32>,
    } else {
    }
    %c0_2 = arith.constant 0 : index
    %c0_3 = arith.constant 0 : index
    %4 = vector.load %arg10[%c0_2, %c0_3] : memref<16x32xbf16, #tpu.memory_space<vmem>>, vector<16x32xbf16>
    %c0_4 = arith.constant 0 : index
    %c0_5 = arith.constant 0 : index
    %5 = vector.load %arg5[%c0_4, %c0_5] : memref<32x128xbf16, #tpu.memory_space<vmem>>, vector<32x128xbf16>
    %cst = arith.constant dense<0.000000e+00> : vector<16x128xf32>
    %6 = tpu.matmul %4, %5, %cst {dimension_numbers = #tpu.dot_dimension_numbers<[1], [0], [0], [1], [0, 0, 1, 1], [], []>} : vector<16x32xbf16>, vector<32x128xbf16>, vector<16x128xf32> -> vector<16x128xf32>
    %c0_6 = arith.constant 0 : index
    %c0_7 = arith.constant 0 : index
    %7 = vector.load %arg6[%c0_6, %c0_7] : memref<1x128xf32, #tpu.memory_space<vmem>>, vector<1x128xf32>
    %8 = vector.broadcast %7 : vector<1x128xf32> to vector<16x128xf32>
    %9 = arith.addf %6, %8 : vector<16x128xf32>
    %cst_8 = arith.constant 5.000000e-01 : f32
    %10 = vector.broadcast %cst_8 : f32 to vector<16x128xf32>
    %11 = arith.mulf %10, %9 : vector<16x128xf32>
    %12 = arith.mulf %9, %9 : vector<16x128xf32>
    %13 = arith.mulf %12, %9 : vector<16x128xf32>
    %cst_9 = arith.constant 4.471500e-02 : f32
    %14 = vector.broadcast %cst_9 : f32 to vector<16x128xf32>
    %15 = arith.mulf %14, %13 : vector<16x128xf32>
    %16 = arith.addf %9, %15 : vector<16x128xf32>
    %cst_10 = arith.constant 0.797884583 : f32
    %17 = vector.broadcast %cst_10 : f32 to vector<16x128xf32>
    %18 = arith.mulf %17, %16 : vector<16x128xf32>
    %19 = math.tanh %18 : vector<16x128xf32>
    %cst_11 = arith.constant 1.000000e+00 : f32
    %20 = vector.broadcast %cst_11 : f32 to vector<16x128xf32>
    %21 = arith.addf %20, %19 : vector<16x128xf32>
    %22 = arith.mulf %11, %21 : vector<16x128xf32>
    %c0_12 = arith.constant 0 : index
    %c0_13 = arith.constant 0 : index
    %23 = vector.load %arg11[%c0_12, %c0_13] : memref<16x32xf32, #tpu.memory_space<vmem>>, vector<16x32xf32>
    %24 = arith.truncf %22 : vector<16x128xf32> to vector<16x128xbf16>
    %c0_14 = arith.constant 0 : index
    %c0_15 = arith.constant 0 : index
    %25 = vector.load %arg7[%c0_14, %c0_15] : memref<128x32xbf16, #tpu.memory_space<vmem>>, vector<128x32xbf16>
    %cst_16 = arith.constant dense<0.000000e+00> : vector<16x32xf32>
    %26 = tpu.matmul %24, %25, %cst_16 {dimension_numbers = #tpu.dot_dimension_numbers<[1], [0], [0], [1], [0, 0, 1, 1], [], []>} : vector<16x128xbf16>, vector<128x32xbf16>, vector<16x32xf32> -> vector<16x32xf32>
    %27 = arith.addf %23, %26 : vector<16x32xf32>
    %c0_17 = arith.constant 0 : index
    %c0_18 = arith.constant 0 : index
    %28 = vector.load %arg11[%c0_17, %c0_18] : memref<16x32xf32, #tpu.memory_space<vmem>>, vector<16x32xf32>
    tpu.vector_store %arg11[%c0_17, %c0_18], %27 {strides = array<i32>} : memref<16x32xf32, #tpu.memory_space<vmem>>, vector<16x32xf32>,
    %c0_i32_19 = arith.constant 0 : i32
    %29 = arith.cmpi eq, %arg1, %c0_i32_19 : i32
    %30 = arith.extui %29 : i1 to i32
    %c0_i32_20 = arith.constant 0 : i32
    %31 = arith.cmpi ne, %30, %c0_i32_20 : i32
    scf.if %31 {
      %c0_21 = arith.constant 0 : index
      %c0_22 = arith.constant 0 : index
      %32 = vector.load %arg11[%c0_21, %c0_22] : memref<16x32xf32, #tpu.memory_space<vmem>>, vector<16x32xf32>
      %c0_23 = arith.constant 0 : index
      %c0_24 = arith.constant 0 : index
      %33 = vector.load %arg9[%c0_23, %c0_24] : memref<16x32xf32, #tpu.memory_space<vmem>>, vector<16x32xf32>
      tpu.vector_store %arg9[%c0_23, %c0_24], %32 {strides = array<i32>} : memref<16x32xf32, #tpu.memory_space<vmem>>, vector<16x32xf32>,
    } else {
    }
    return
  }
  func.func @transform_0(%arg0: i32, %arg1: i32) -> (i32, i32) {
    %c0_i32 = arith.constant 0 : i32
    %c0_i32_0 = arith.constant 0 : i32
    return %arg0, %c0_i32 : i32, i32
  }
  func.func @transform_1(%arg0: i32, %arg1: i32) -> (i32, i32) {
    %c0_i32 = arith.constant 0 : i32
    %c0_i32_0 = arith.constant 0 : i32
    %c0_i32_1 = arith.constant 0 : i32
    return %c0_i32, %c0_i32_0 : i32, i32
  }
  func.func @transform_2(%arg0: i32, %arg1: i32) -> (i32, i32) {
    %c0_i32 = arith.constant 0 : i32
    %c0_i32_0 = arith.constant 0 : i32
    %c0_i32_1 = arith.constant 0 : i32
    return %c0_i32, %c0_i32_0 : i32, i32
  }
  func.func @transform_3(%arg0: i32, %arg1: i32) -> (i32, i32) {
    %c0_i32 = arith.constant 0 : i32
    %c0_i32_0 = arith.constant 0 : i32
    return %c0_i32, %arg1 : i32, i32
  }
  func.func @transform_4(%arg0: i32, %arg1: i32) -> (i32, i32) {
    %c0_i32 = arith.constant 0 : i32
    %c0_i32_0 = arith.constant 0 : i32
    return %c0_i32, %arg1 : i32, i32
  }
  func.func @transform_5(%arg0: i32, %arg1: i32) -> (i32, i32) {
    %c0_i32 = arith.constant 0 : i32
    %c0_i32_0 = arith.constant 0 : i32
    return %arg1, %c0_i32 : i32, i32
  }
  func.func @transform_6(%arg0: i32, %arg1: i32) -> (i32, i32) {
    %c0_i32 = arith.constant 0 : i32
    %c0_i32_0 = arith.constant 0 : i32
    %c0_i32_1 = arith.constant 0 : i32
    return %c0_i32, %c0_i32_0 : i32, i32
  }
  func.func @transform_7(%arg0: i32, %arg1: i32) -> (i32, i32) {
    %c0_i32 = arith.constant 0 : i32
    %c0_i32_0 = arith.constant 0 : i32
    return %arg0, %c0_i32 : i32, i32
  }
}

module attributes {stable_mosaic.version = 11 : i64} {
  func.func @_attn_sublayer_kernel(%arg0: i32, %arg1: i32, %arg2: memref<1x1x8xf32, #tpu.memory_space<vmem>>, %arg3: memref<1x8x32xf32, #tpu.memory_space<vmem>>, %arg4: memref<1x8x32xbf16, #tpu.memory_space<vmem>>, %arg5: memref<1x8x2xf32, #tpu.memory_space<vmem>>, %arg6: memref<32x32xbf16, #tpu.memory_space<vmem>>, %arg7: memref<2x32xf32, #tpu.memory_space<vmem>>, %arg8: memref<1x32xf32, #tpu.memory_space<vmem>>, %arg9: memref<32x32xbf16, #tpu.memory_space<vmem>>, %arg10: memref<2x32xf32, #tpu.memory_space<vmem>>, %arg11: memref<1x32xf32, #tpu.memory_space<vmem>>, %arg12: memref<32x32xbf16, #tpu.memory_space<vmem>>, %arg13: memref<1x32xf32, #tpu.memory_space<vmem>>, %arg14: memref<32x32xbf16, #tpu.memory_space<vmem>>, %arg15: memref<1x32xf32, #tpu.memory_space<vmem>>, %arg16: memref<1x32xf32, #tpu.memory_space<vmem>>, %arg17: memref<1x32xf32, #tpu.memory_space<vmem>>, %arg18: memref<1x8x32xf32, #tpu.memory_space<vmem>>, %arg19: memref<8x32xbf16, #tpu.memory_space<vmem>>, %arg20: memref<2x8x1xf32, #tpu.memory_space<vmem>>, %arg21: memref<2x8x1xf32, #tpu.memory_space<vmem>>, %arg22: memref<8x32xf32, #tpu.memory_space<vmem>>) attributes {dimension_semantics = [#tpu.dimension_semantics<parallel>, #tpu.dimension_semantics<arbitrary>], iteration_bounds = array<i64: 2, 1>, scalar_prefetch = 0 : i64, scratch_operands = 4 : i64, tpu.core_type = #tpu.core_type<tc>, window_params = [{transform_indices = @transform_0, window_bounds = array<i64: 1, 1, 8>}, {transform_indices = @transform_1, window_bounds = array<i64: 1, 8, 32>}, {transform_indices = @transform_2, window_bounds = array<i64: 1, 8, 32>}, {transform_indices = @transform_3, window_bounds = array<i64: 1, 8, 2>}, {pipeline_mode = #tpu.pipeline_mode<synchronous>, transform_indices = @transform_4, window_bounds = array<i64: 32, 32>}, {pipeline_mode = #tpu.pipeline_mode<synchronous>, transform_indices = @transform_5, window_bounds = array<i64: 2, 32>}, {pipeline_mode = #tpu.pipeline_mode<synchronous>, transform_indices = @transform_6, window_bounds = array<i64: 1, 32>}, {pipeline_mode = #tpu.pipeline_mode<synchronous>, transform_indices = @transform_7, window_bounds = array<i64: 32, 32>}, {pipeline_mode = #tpu.pipeline_mode<synchronous>, transform_indices = @transform_8, window_bounds = array<i64: 2, 32>}, {pipeline_mode = #tpu.pipeline_mode<synchronous>, transform_indices = @transform_9, window_bounds = array<i64: 1, 32>}, {pipeline_mode = #tpu.pipeline_mode<synchronous>, transform_indices = @transform_10, window_bounds = array<i64: 32, 32>}, {pipeline_mode = #tpu.pipeline_mode<synchronous>, transform_indices = @transform_11, window_bounds = array<i64: 1, 32>}, {pipeline_mode = #tpu.pipeline_mode<synchronous>, transform_indices = @transform_12, window_bounds = array<i64: 32, 32>}, {pipeline_mode = #tpu.pipeline_mode<synchronous>, transform_indices = @transform_13, window_bounds = array<i64: 1, 32>}, {pipeline_mode = #tpu.pipeline_mode<synchronous>, transform_indices = @transform_14, window_bounds = array<i64: 1, 32>}, {pipeline_mode = #tpu.pipeline_mode<synchronous>, transform_indices = @transform_15, window_bounds = array<i64: 1, 32>}, {transform_indices = @transform_16, window_bounds = array<i64: 1, 8, 32>}]} {
    %c0_i32 = arith.constant 0 : i32
    %0 = arith.cmpi eq, %arg1, %c0_i32 : i32
    %1 = arith.extui %0 : i1 to i32
    %c0_i32_0 = arith.constant 0 : i32
    %2 = arith.cmpi ne, %1, %c0_i32_0 : i32
    scf.if %2 {
      %c0_74 = arith.constant 0 : index
      %c0_75 = arith.constant 0 : index
      %c0_76 = arith.constant 0 : index
      %145 = vector.load %arg4[%c0_74, %c0_75, %c0_76] : memref<1x8x32xbf16, #tpu.memory_space<vmem>>, vector<1x8x32xbf16>
      %146 = vector.shape_cast %145 : vector<1x8x32xbf16> to vector<8x32xbf16>
      %c0_77 = arith.constant 0 : index
      %c0_78 = arith.constant 0 : index
      %c0_79 = arith.constant 0 : index
      %147 = vector.load %arg5[%c0_77, %c0_78, %c0_79] : memref<1x8x2xf32, #tpu.memory_space<vmem>>, vector<1x8x2xf32>
      %148 = vector.shape_cast %147 : vector<1x8x2xf32> to vector<8x2xf32>
      %c0_80 = arith.constant 0 : index
      %c0_81 = arith.constant 0 : index
      %149 = vector.load %arg6[%c0_80, %c0_81] : memref<32x32xbf16, #tpu.memory_space<vmem>>, vector<32x32xbf16>
      %cst_82 = arith.constant dense<0.000000e+00> : vector<8x32xf32>
      %150 = tpu.matmul %146, %149, %cst_82 {dimension_numbers = #tpu.dot_dimension_numbers<[1], [0], [0], [1], [0, 0, 1, 1], [], []>} : vector<8x32xbf16>, vector<32x32xbf16>, vector<8x32xf32> -> vector<8x32xf32>
      %151 = vector.extract_strided_slice %148 {offsets = [0, 0], sizes = [8, 1], strides = [1, 1]} : vector<8x2xf32> to vector<8x1xf32>
      %c0_83 = arith.constant 0 : index
      %c0_84 = arith.constant 0 : index
      %152 = vector.load %arg7[%c0_83, %c0_84] : memref<2x32xf32, #tpu.memory_space<vmem>>, vector<1x32xf32>
      %153 = vector.broadcast %151 : vector<8x1xf32> to vector<8x32xf32>
      %154 = vector.broadcast %152 : vector<1x32xf32> to vector<8x32xf32>
      %155 = arith.mulf %153, %154 : vector<8x32xf32>
      %156 = arith.addf %150, %155 : vector<8x32xf32>
      %157 = vector.extract_strided_slice %148 {offsets = [0, 1], sizes = [8, 1], strides = [1, 1]} : vector<8x2xf32> to vector<8x1xf32>
      %c1_85 = arith.constant 1 : index
      %c0_86 = arith.constant 0 : index
      %158 = vector.load %arg7[%c1_85, %c0_86] : memref<2x32xf32, #tpu.memory_space<vmem>>, vector<1x32xf32>
      %159 = vector.broadcast %157 : vector<8x1xf32> to vector<8x32xf32>
      %160 = vector.broadcast %158 : vector<1x32xf32> to vector<8x32xf32>
      %161 = arith.mulf %159, %160 : vector<8x32xf32>
      %162 = arith.addf %156, %161 : vector<8x32xf32>
      %c0_87 = arith.constant 0 : index
      %c0_88 = arith.constant 0 : index
      %163 = vector.load %arg8[%c0_87, %c0_88] : memref<1x32xf32, #tpu.memory_space<vmem>>, vector<1x32xf32>
      %164 = vector.broadcast %163 : vector<1x32xf32> to vector<8x32xf32>
      %165 = arith.addf %162, %164 : vector<8x32xf32>
      %cst_89 = arith.constant 2.500000e-01 : f32
      %166 = vector.broadcast %cst_89 : f32 to vector<8x32xf32>
      %167 = arith.mulf %165, %166 : vector<8x32xf32>
      %168 = arith.truncf %167 : vector<8x32xf32> to vector<8x32xbf16>
      %c0_90 = arith.constant 0 : index
      %c0_91 = arith.constant 0 : index
      %169 = vector.load %arg19[%c0_90, %c0_91] : memref<8x32xbf16, #tpu.memory_space<vmem>>, vector<8x32xbf16>
      tpu.vector_store %arg19[%c0_90, %c0_91], %168 {strides = array<i32>} : memref<8x32xbf16, #tpu.memory_space<vmem>>, vector<8x32xbf16>,
      %cst_92 = arith.constant 0xFF800000 : f32
      %170 = vector.broadcast %cst_92 : f32 to vector<2x8x1xf32>
      %c0_93 = arith.constant 0 : index
      %c0_94 = arith.constant 0 : index
      %c0_95 = arith.constant 0 : index
      %171 = vector.load %arg20[%c0_93, %c0_94, %c0_95] : memref<2x8x1xf32, #tpu.memory_space<vmem>>, vector<2x8x1xf32>
      tpu.vector_store %arg20[%c0_93, %c0_94, %c0_95], %170 {strides = array<i32>} : memref<2x8x1xf32, #tpu.memory_space<vmem>>, vector<2x8x1xf32>,
      %cst_96 = arith.constant 0.000000e+00 : f32
      %172 = vector.broadcast %cst_96 : f32 to vector<2x8x1xf32>
      %c0_97 = arith.constant 0 : index
      %c0_98 = arith.constant 0 : index
      %c0_99 = arith.constant 0 : index
      %173 = vector.load %arg21[%c0_97, %c0_98, %c0_99] : memref<2x8x1xf32, #tpu.memory_space<vmem>>, vector<2x8x1xf32>
      tpu.vector_store %arg21[%c0_97, %c0_98, %c0_99], %172 {strides = array<i32>} : memref<2x8x1xf32, #tpu.memory_space<vmem>>, vector<2x8x1xf32>,
      %cst_100 = arith.constant 0.000000e+00 : f32
      %174 = vector.broadcast %cst_100 : f32 to vector<8x32xf32>
      %c0_101 = arith.constant 0 : index
      %c0_102 = arith.constant 0 : index
      %175 = vector.load %arg22[%c0_101, %c0_102] : memref<8x32xf32, #tpu.memory_space<vmem>>, vector<8x32xf32>
      tpu.vector_store %arg22[%c0_101, %c0_102], %174 {strides = array<i32>} : memref<8x32xf32, #tpu.memory_space<vmem>>, vector<8x32xf32>,
    } else {
    }
    %c8_i32 = arith.constant 8 : i32
    %3 = arith.muli %arg1, %c8_i32 : i32
    %4 = tpu.assume_multiple %3, 8 : i32
    %c0 = arith.constant 0 : index
    %5 = arith.index_cast %4 : i32 to index
    %c0_1 = arith.constant 0 : index
    %6 = vector.load %arg3[%c0, %5, %c0_1] : memref<1x8x32xf32, #tpu.memory_space<vmem>>, vector<1x8x32xf32>
    %7 = vector.shape_cast %6 : vector<1x8x32xf32> to vector<8x32xf32>
    %c0_2 = arith.constant 0 : index
    %8 = arith.index_cast %4 : i32 to index
    %c0_3 = arith.constant 0 : index
    %9 = vector.load %arg4[%c0_2, %8, %c0_3] : memref<1x8x32xbf16, #tpu.memory_space<vmem>>, vector<1x8x32xbf16>
    %10 = vector.shape_cast %9 : vector<1x8x32xbf16> to vector<8x32xbf16>
    %c0_4 = arith.constant 0 : index
    %11 = arith.index_cast %4 : i32 to index
    %c0_5 = arith.constant 0 : index
    %12 = vector.load %arg5[%c0_4, %11, %c0_5] : memref<1x8x2xf32, #tpu.memory_space<vmem>>, vector<1x8x2xf32>
    %13 = vector.shape_cast %12 : vector<1x8x2xf32> to vector<8x2xf32>
    %c0_6 = arith.constant 0 : index
    %c0_7 = arith.constant 0 : index
    %14 = vector.load %arg9[%c0_6, %c0_7] : memref<32x32xbf16, #tpu.memory_space<vmem>>, vector<32x32xbf16>
    %cst = arith.constant dense<0.000000e+00> : vector<8x32xf32>
    %15 = tpu.matmul %10, %14, %cst {dimension_numbers = #tpu.dot_dimension_numbers<[1], [0], [0], [1], [0, 0, 1, 1], [], []>} : vector<8x32xbf16>, vector<32x32xbf16>, vector<8x32xf32> -> vector<8x32xf32>
    %16 = vector.extract_strided_slice %13 {offsets = [0, 0], sizes = [8, 1], strides = [1, 1]} : vector<8x2xf32> to vector<8x1xf32>
    %c0_8 = arith.constant 0 : index
    %c0_9 = arith.constant 0 : index
    %17 = vector.load %arg10[%c0_8, %c0_9] : memref<2x32xf32, #tpu.memory_space<vmem>>, vector<1x32xf32>
    %18 = vector.broadcast %16 : vector<8x1xf32> to vector<8x32xf32>
    %19 = vector.broadcast %17 : vector<1x32xf32> to vector<8x32xf32>
    %20 = arith.mulf %18, %19 : vector<8x32xf32>
    %21 = arith.addf %15, %20 : vector<8x32xf32>
    %22 = vector.extract_strided_slice %13 {offsets = [0, 1], sizes = [8, 1], strides = [1, 1]} : vector<8x2xf32> to vector<8x1xf32>
    %c1 = arith.constant 1 : index
    %c0_10 = arith.constant 0 : index
    %23 = vector.load %arg10[%c1, %c0_10] : memref<2x32xf32, #tpu.memory_space<vmem>>, vector<1x32xf32>
    %24 = vector.broadcast %22 : vector<8x1xf32> to vector<8x32xf32>
    %25 = vector.broadcast %23 : vector<1x32xf32> to vector<8x32xf32>
    %26 = arith.mulf %24, %25 : vector<8x32xf32>
    %27 = arith.addf %21, %26 : vector<8x32xf32>
    %c0_11 = arith.constant 0 : index
    %c0_12 = arith.constant 0 : index
    %28 = vector.load %arg11[%c0_11, %c0_12] : memref<1x32xf32, #tpu.memory_space<vmem>>, vector<1x32xf32>
    %29 = vector.broadcast %28 : vector<1x32xf32> to vector<8x32xf32>
    %30 = arith.addf %27, %29 : vector<8x32xf32>
    %31 = arith.truncf %30 : vector<8x32xf32> to vector<8x32xbf16>
    %cst_13 = arith.constant dense<0.000000e+00> : vector<8xf32>
    %32 = vector.multi_reduction <add>, %7, %cst_13 [1] : vector<8x32xf32> to vector<8xf32>
    %33 = vector.shape_cast %32 : vector<8xf32> to vector<8x1xf32>
    %cst_14 = arith.constant 3.200000e+01 : f32
    %34 = vector.broadcast %cst_14 : f32 to vector<8x1xf32>
    %35 = arith.divf %33, %34 : vector<8x1xf32>
    %36 = vector.broadcast %35 : vector<8x1xf32> to vector<8x32xf32>
    %37 = arith.subf %7, %36 : vector<8x32xf32>
    %38 = arith.mulf %37, %37 : vector<8x32xf32>
    %cst_15 = arith.constant dense<0.000000e+00> : vector<8xf32>
    %39 = vector.multi_reduction <add>, %38, %cst_15 [1] : vector<8x32xf32> to vector<8xf32>
    %40 = vector.shape_cast %39 : vector<8xf32> to vector<8x1xf32>
    %cst_16 = arith.constant 3.200000e+01 : f32
    %41 = vector.broadcast %cst_16 : f32 to vector<8x1xf32>
    %42 = arith.divf %40, %41 : vector<8x1xf32>
    %cst_17 = arith.constant 1.03225803 : f32
    %43 = vector.broadcast %cst_17 : f32 to vector<8x1xf32>
    %44 = arith.mulf %42, %43 : vector<8x1xf32>
    %c0_18 = arith.constant 0 : index
    %c0_19 = arith.constant 0 : index
    %45 = vector.load %arg16[%c0_18, %c0_19] : memref<1x32xf32, #tpu.memory_space<vmem>>, vector<1x32xf32>
    %46 = vector.broadcast %45 : vector<1x32xf32> to vector<8x32xf32>
    %47 = arith.mulf %46, %37 : vector<8x32xf32>
    %48 = math.sqrt %44 : vector<8x1xf32>
    %cst_20 = arith.constant 9.99999997E-7 : f32
    %49 = vector.broadcast %cst_20 : f32 to vector<8x1xf32>
    %50 = arith.addf %48, %49 : vector<8x1xf32>
    %51 = vector.broadcast %50 : vector<8x1xf32> to vector<8x32xf32>
    %52 = arith.divf %47, %51 : vector<8x32xf32>
    %c0_21 = arith.constant 0 : index
    %c0_22 = arith.constant 0 : index
    %53 = vector.load %arg17[%c0_21, %c0_22] : memref<1x32xf32, #tpu.memory_space<vmem>>, vector<1x32xf32>
    %54 = vector.broadcast %53 : vector<1x32xf32> to vector<8x32xf32>
    %55 = arith.addf %52, %54 : vector<8x32xf32>
    %56 = arith.truncf %55 : vector<8x32xf32> to vector<8x32xbf16>
    %c0_23 = arith.constant 0 : index
    %c0_24 = arith.constant 0 : index
    %57 = vector.load %arg12[%c0_23, %c0_24] : memref<32x32xbf16, #tpu.memory_space<vmem>>, vector<32x32xbf16>
    %cst_25 = arith.constant dense<0.000000e+00> : vector<8x32xf32>
    %58 = tpu.matmul %56, %57, %cst_25 {dimension_numbers = #tpu.dot_dimension_numbers<[1], [0], [0], [1], [0, 0, 1, 1], [], []>} : vector<8x32xbf16>, vector<32x32xbf16>, vector<8x32xf32> -> vector<8x32xf32>
    %c0_26 = arith.constant 0 : index
    %c0_27 = arith.constant 0 : index
    %59 = vector.load %arg13[%c0_26, %c0_27] : memref<1x32xf32, #tpu.memory_space<vmem>>, vector<1x32xf32>
    %60 = vector.broadcast %59 : vector<1x32xf32> to vector<8x32xf32>
    %61 = arith.addf %58, %60 : vector<8x32xf32>
    %62 = arith.truncf %61 : vector<8x32xf32> to vector<8x32xbf16>
    %c0_28 = arith.constant 0 : index
    %c0_29 = arith.constant 0 : index
    %c0_30 = arith.constant 0 : index
    %63 = vector.load %arg2[%c0_28, %c0_29, %c0_30] : memref<1x1x8xf32, #tpu.memory_space<vmem>>, vector<1x1x8xf32>
    %64 = vector.shape_cast %63 : vector<1x1x8xf32> to vector<1x8xf32>
    %cst_31 = arith.constant 0.000000e+00 : f32
    %65 = vector.broadcast %cst_31 : f32 to vector<1x8xf32>
    %66 = arith.cmpf oeq, %64, %65 : vector<1x8xf32>
    %cst_32 = arith.constant -1.000000e+09 : f32
    %cst_33 = arith.constant 0.000000e+00 : f32
    %67 = vector.broadcast %cst_32 : f32 to vector<1x8xf32>
    %68 = vector.broadcast %cst_33 : f32 to vector<1x8xf32>
    %69 = arith.select %66, %67, %68 : vector<1x8xi1>, vector<1x8xf32>
    %c0_34 = arith.constant 0 : index
    %c0_35 = arith.constant 0 : index
    %70 = vector.load %arg19[%c0_34, %c0_35] : memref<8x32xbf16, #tpu.memory_space<vmem>>, vector<8x32xbf16>
    %c0_36 = arith.constant 0 : index
    %c0_37 = arith.constant 0 : index
    %71 = vector.load %arg22[%c0_36, %c0_37] : memref<8x32xf32, #tpu.memory_space<vmem>>, vector<8x32xf32>
    %72 = vector.extract_strided_slice %70 {offsets = [0, 0], sizes = [8, 16], strides = [1, 1]} : vector<8x32xbf16> to vector<8x16xbf16>
    %73 = vector.extract_strided_slice %31 {offsets = [0, 0], sizes = [8, 16], strides = [1, 1]} : vector<8x32xbf16> to vector<8x16xbf16>
    %cst_38 = arith.constant dense<0.000000e+00> : vector<8x8xf32>
    %74 = tpu.matmul %72, %73, %cst_38 {dimension_numbers = #tpu.dot_dimension_numbers<[1], [1], [0], [0], [0, 0, 1, 0], [], []>} : vector<8x16xbf16>, vector<8x16xbf16>, vector<8x8xf32> -> vector<8x8xf32>
    %75 = vector.broadcast %69 : vector<1x8xf32> to vector<8x8xf32>
    %76 = arith.addf %74, %75 : vector<8x8xf32>
    %c0_39 = arith.constant 0 : index
    %c0_40 = arith.constant 0 : index
    %c0_41 = arith.constant 0 : index
    %77 = vector.load %arg20[%c0_39, %c0_40, %c0_41] : memref<2x8x1xf32, #tpu.memory_space<vmem>>, vector<1x8x1xf32>
    %78 = vector.shape_cast %77 : vector<1x8x1xf32> to vector<8x1xf32>
    %cst_42 = arith.constant dense<0xFF800000> : vector<8xf32>
    %79 = vector.multi_reduction <maximumf>, %76, %cst_42 [1] : vector<8x8xf32> to vector<8xf32>
    %80 = vector.shape_cast %79 : vector<8xf32> to vector<8x1xf32>
    %81 = arith.maximumf %78, %80 : vector<8x1xf32>
    %82 = arith.subf %78, %81 : vector<8x1xf32>
    %83 = math.exp %82 : vector<8x1xf32>
    %84 = vector.broadcast %81 : vector<8x1xf32> to vector<8x8xf32>
    %85 = arith.subf %76, %84 : vector<8x8xf32>
    %86 = math.exp %85 : vector<8x8xf32>
    %c0_43 = arith.constant 0 : index
    %c0_44 = arith.constant 0 : index
    %c0_45 = arith.constant 0 : index
    %87 = vector.load %arg21[%c0_43, %c0_44, %c0_45] : memref<2x8x1xf32, #tpu.memory_space<vmem>>, vector<1x8x1xf32>
    %88 = vector.shape_cast %87 : vector<1x8x1xf32> to vector<8x1xf32>
    %89 = arith.mulf %83, %88 : vector<8x1xf32>
    %cst_46 = arith.constant dense<0.000000e+00> : vector<8xf32>
    %90 = vector.multi_reduction <add>, %86, %cst_46 [1] : vector<8x8xf32> to vector<8xf32>
    %91 = vector.shape_cast %90 : vector<8xf32> to vector<8x1xf32>
    %92 = arith.addf %89, %91 : vector<8x1xf32>
    %c0_47 = arith.constant 0 : index
    %c0_48 = arith.constant 0 : index
    %c0_49 = arith.constant 0 : index
    %93 = vector.load %arg21[%c0_47, %c0_48, %c0_49] : memref<2x8x1xf32, #tpu.memory_space<vmem>>, vector<1x8x1xf32>
    %94 = vector.shape_cast %93 : vector<1x8x1xf32> to vector<8x1xf32>
    %95 = vector.shape_cast %92 : vector<8x1xf32> to vector<1x8x1xf32>
    tpu.vector_store %arg21[%c0_47, %c0_48, %c0_49], %95 {strides = array<i32>} : memref<2x8x1xf32, #tpu.memory_space<vmem>>, vector<1x8x1xf32>,
    %c0_50 = arith.constant 0 : index
    %c0_51 = arith.constant 0 : index
    %c0_52 = arith.constant 0 : index
    %96 = vector.load %arg20[%c0_50, %c0_51, %c0_52] : memref<2x8x1xf32, #tpu.memory_space<vmem>>, vector<1x8x1xf32>
    %97 = vector.shape_cast %96 : vector<1x8x1xf32> to vector<8x1xf32>
    %98 = vector.shape_cast %81 : vector<8x1xf32> to vector<1x8x1xf32>
    tpu.vector_store %arg20[%c0_50, %c0_51, %c0_52], %98 {strides = array<i32>} : memref<2x8x1xf32, #tpu.memory_space<vmem>>, vector<1x8x1xf32>,
    %99 = arith.truncf %86 : vector<8x8xf32> to vector<8x8xbf16>
    %100 = vector.extract_strided_slice %62 {offsets = [0, 0], sizes = [8, 16], strides = [1, 1]} : vector<8x32xbf16> to vector<8x16xbf16>
    %cst_53 = arith.constant dense<0.000000e+00> : vector<8x16xf32>
    %101 = tpu.matmul %99, %100, %cst_53 {dimension_numbers = #tpu.dot_dimension_numbers<[1], [0], [0], [1], [0, 0, 1, 1], [], []>} : vector<8x8xbf16>, vector<8x16xbf16>, vector<8x16xf32> -> vector<8x16xf32>
    %102 = vector.extract_strided_slice %71 {offsets = [0, 0], sizes = [8, 16], strides = [1, 1]} : vector<8x32xf32> to vector<8x16xf32>
    %103 = vector.broadcast %83 : vector<8x1xf32> to vector<8x16xf32>
    %104 = arith.mulf %103, %102 : vector<8x16xf32>
    %105 = arith.addf %104, %101 : vector<8x16xf32>
    %106 = vector.extract_strided_slice %70 {offsets = [0, 16], sizes = [8, 16], strides = [1, 1]} : vector<8x32xbf16> to vector<8x16xbf16>
    %107 = vector.extract_strided_slice %31 {offsets = [0, 16], sizes = [8, 16], strides = [1, 1]} : vector<8x32xbf16> to vector<8x16xbf16>
    %cst_54 = arith.constant dense<0.000000e+00> : vector<8x8xf32>
    %108 = tpu.matmul %106, %107, %cst_54 {dimension_numbers = #tpu.dot_dimension_numbers<[1], [1], [0], [0], [0, 0, 1, 0], [], []>} : vector<8x16xbf16>, vector<8x16xbf16>, vector<8x8xf32> -> vector<8x8xf32>
    %109 = vector.broadcast %69 : vector<1x8xf32> to vector<8x8xf32>
    %110 = arith.addf %108, %109 : vector<8x8xf32>
    %c1_55 = arith.constant 1 : index
    %c0_56 = arith.constant 0 : index
    %c0_57 = arith.constant 0 : index
    %111 = vector.load %arg20[%c1_55, %c0_56, %c0_57] : memref<2x8x1xf32, #tpu.memory_space<vmem>>, vector<1x8x1xf32>
    %112 = vector.shape_cast %111 : vector<1x8x1xf32> to vector<8x1xf32>
    %cst_58 = arith.constant dense<0xFF800000> : vector<8xf32>
    %113 = vector.multi_reduction <maximumf>, %110, %cst_58 [1] : vector<8x8xf32> to vector<8xf32>
    %114 = vector.shape_cast %113 : vector<8xf32> to vector<8x1xf32>
    %115 = arith.maximumf %112, %114 : vector<8x1xf32>
    %116 = arith.subf %112, %115 : vector<8x1xf32>
    %117 = math.exp %116 : vector<8x1xf32>
    %118 = vector.broadcast %115 : vector<8x1xf32> to vector<8x8xf32>
    %119 = arith.subf %110, %118 : vector<8x8xf32>
    %120 = math.exp %119 : vector<8x8xf32>
    %c1_59 = arith.constant 1 : index
    %c0_60 = arith.constant 0 : index
    %c0_61 = arith.constant 0 : index
    %121 = vector.load %arg21[%c1_59, %c0_60, %c0_61] : memref<2x8x1xf32, #tpu.memory_space<vmem>>, vector<1x8x1xf32>
    %122 = vector.shape_cast %121 : vector<1x8x1xf32> to vector<8x1xf32>
    %123 = arith.mulf %117, %122 : vector<8x1xf32>
    %cst_62 = arith.constant dense<0.000000e+00> : vector<8xf32>
    %124 = vector.multi_reduction <add>, %120, %cst_62 [1] : vector<8x8xf32> to vector<8xf32>
    %125 = vector.shape_cast %124 : vector<8xf32> to vector<8x1xf32>
    %126 = arith.addf %123, %125 : vector<8x1xf32>
    %c1_63 = arith.constant 1 : index
    %c0_64 = arith.constant 0 : index
    %c0_65 = arith.constant 0 : index
    %127 = vector.load %arg21[%c1_63, %c0_64, %c0_65] : memref<2x8x1xf32, #tpu.memory_space<vmem>>, vector<1x8x1xf32>
    %128 = vector.shape_cast %127 : vector<1x8x1xf32> to vector<8x1xf32>
    %129 = vector.shape_cast %126 : vector<8x1xf32> to vector<1x8x1xf32>
    tpu.vector_store %arg21[%c1_63, %c0_64, %c0_65], %129 {strides = array<i32>} : memref<2x8x1xf32, #tpu.memory_space<vmem>>, vector<1x8x1xf32>,
    %c1_66 = arith.constant 1 : index
    %c0_67 = arith.constant 0 : index
    %c0_68 = arith.constant 0 : index
    %130 = vector.load %arg20[%c1_66, %c0_67, %c0_68] : memref<2x8x1xf32, #tpu.memory_space<vmem>>, vector<1x8x1xf32>
    %131 = vector.shape_cast %130 : vector<1x8x1xf32> to vector<8x1xf32>
    %132 = vector.shape_cast %115 : vector<8x1xf32> to vector<1x8x1xf32>
    tpu.vector_store %arg20[%c1_66, %c0_67, %c0_68], %132 {strides = array<i32>} : memref<2x8x1xf32, #tpu.memory_space<vmem>>, vector<1x8x1xf32>,
    %133 = arith.truncf %120 : vector<8x8xf32> to vector<8x8xbf16>
    %134 = vector.extract_strided_slice %62 {offsets = [0, 16], sizes = [8, 16], strides = [1, 1]} : vector<8x32xbf16> to vector<8x16xbf16>
    %cst_69 = arith.constant dense<0.000000e+00> : vector<8x16xf32>
    %135 = tpu.matmul %133, %134, %cst_69 {dimension_numbers = #tpu.dot_dimension_numbers<[1], [0], [0], [1], [0, 0, 1, 1], [], []>} : vector<8x8xbf16>, vector<8x16xbf16>, vector<8x16xf32> -> vector<8x16xf32>
    %136 = vector.extract_strided_slice %71 {offsets = [0, 16], sizes = [8, 16], strides = [1, 1]} : vector<8x32xf32> to vector<8x16xf32>
    %137 = vector.broadcast %117 : vector<8x1xf32> to vector<8x16xf32>
    %138 = arith.mulf %137, %136 : vector<8x16xf32>
    %139 = arith.addf %138, %135 : vector<8x16xf32>
    %140 = tpu.concatenate %105, %139 in 1 : vector<8x16xf32>, vector<8x16xf32> -> vector<8x32xf32>
    %c0_70 = arith.constant 0 : index
    %c0_71 = arith.constant 0 : index
    %141 = vector.load %arg22[%c0_70, %c0_71] : memref<8x32xf32, #tpu.memory_space<vmem>>, vector<8x32xf32>
    tpu.vector_store %arg22[%c0_70, %c0_71], %140 {strides = array<i32>} : memref<8x32xf32, #tpu.memory_space<vmem>>, vector<8x32xf32>,
    %c0_i32_72 = arith.constant 0 : i32
    %142 = arith.cmpi eq, %arg1, %c0_i32_72 : i32
    %143 = arith.extui %142 : i1 to i32
    %c0_i32_73 = arith.constant 0 : i32
    %144 = arith.cmpi ne, %143, %c0_i32_73 : i32
    scf.if %144 {
      %c0_74 = arith.constant 0 : index
      %c0_75 = arith.constant 0 : index
      %145 = vector.load %arg22[%c0_74, %c0_75] : memref<8x32xf32, #tpu.memory_space<vmem>>, vector<8x32xf32>
      %146 = vector.extract_strided_slice %145 {offsets = [0, 0], sizes = [8, 16], strides = [1, 1]} : vector<8x32xf32> to vector<8x16xf32>
      %c0_76 = arith.constant 0 : index
      %c0_77 = arith.constant 0 : index
      %c0_78 = arith.constant 0 : index
      %147 = vector.load %arg21[%c0_76, %c0_77, %c0_78] : memref<2x8x1xf32, #tpu.memory_space<vmem>>, vector<1x8x1xf32>
      %148 = vector.shape_cast %147 : vector<1x8x1xf32> to vector<8x1xf32>
      %149 = tpu.reciprocal %148 {approx = true} : vector<8x1xf32> -> vector<8x1xf32>
      %150 = vector.broadcast %149 : vector<8x1xf32> to vector<8x16xf32>
      %151 = arith.mulf %146, %150 : vector<8x16xf32>
      %152 = vector.extract_strided_slice %145 {offsets = [0, 16], sizes = [8, 16], strides = [1, 1]} : vector<8x32xf32> to vector<8x16xf32>
      %c1_79 = arith.constant 1 : index
      %c0_80 = arith.constant 0 : index
      %c0_81 = arith.constant 0 : index
      %153 = vector.load %arg21[%c1_79, %c0_80, %c0_81] : memref<2x8x1xf32, #tpu.memory_space<vmem>>, vector<1x8x1xf32>
      %154 = vector.shape_cast %153 : vector<1x8x1xf32> to vector<8x1xf32>
      %155 = tpu.reciprocal %154 {approx = true} : vector<8x1xf32> -> vector<8x1xf32>
      %156 = vector.broadcast %155 : vector<8x1xf32> to vector<8x16xf32>
      %157 = arith.mulf %152, %156 : vector<8x16xf32>
      %158 = tpu.concatenate %151, %157 in 1 : vector<8x16xf32>, vector<8x16xf32> -> vector<8x32xf32>
      %159 = arith.truncf %158 : vector<8x32xf32> to vector<8x32xbf16>
      %c0_82 = arith.constant 0 : index
      %c0_83 = arith.constant 0 : index
      %c0_84 = arith.constant 0 : index
      %160 = vector.load %arg3[%c0_82, %c0_83, %c0_84] : memref<1x8x32xf32, #tpu.memory_space<vmem>>, vector<1x8x32xf32>
      %161 = vector.shape_cast %160 : vector<1x8x32xf32> to vector<8x32xf32>
      %c0_85 = arith.constant 0 : index
      %c0_86 = arith.constant 0 : index
      %162 = vector.load %arg15[%c0_85, %c0_86] : memref<1x32xf32, #tpu.memory_space<vmem>>, vector<1x32xf32>
      %163 = vector.broadcast %162 : vector<1x32xf32> to vector<8x32xf32>
      %164 = arith.addf %161, %163 : vector<8x32xf32>
      %c0_87 = arith.constant 0 : index
      %c0_88 = arith.constant 0 : index
      %165 = vector.load %arg14[%c0_87, %c0_88] : memref<32x32xbf16, #tpu.memory_space<vmem>>, vector<32x32xbf16>
      %cst_89 = arith.constant dense<0.000000e+00> : vector<8x32xf32>
      %166 = tpu.matmul %159, %165, %cst_89 {dimension_numbers = #tpu.dot_dimension_numbers<[1], [0], [0], [1], [0, 0, 1, 1], [], []>} : vector<8x32xbf16>, vector<32x32xbf16>, vector<8x32xf32> -> vector<8x32xf32>
      %167 = arith.addf %164, %166 : vector<8x32xf32>
      %c0_90 = arith.constant 0 : index
      %c0_91 = arith.constant 0 : index
      %c0_92 = arith.constant 0 : index
      %168 = vector.load %arg18[%c0_90, %c0_91, %c0_92] : memref<1x8x32xf32, #tpu.memory_space<vmem>>, vector<1x8x32xf32>
      %169 = vector.shape_cast %168 : vector<1x8x32xf32> to vector<8x32xf32>
      %170 = vector.shape_cast %167 : vector<8x32xf32> to vector<1x8x32xf32>
      tpu.vector_store %arg18[%c0_90, %c0_91, %c0_92], %170 {strides = array<i32>} : memref<1x8x32xf32, #tpu.memory_space<vmem>>, vector<1x8x32xf32>,
    } else {
    }
    return
  }
  func.func @transform_0(%arg0: i32, %arg1: i32) -> (i32, i32, i32) {
    %c0_i32 = arith.constant 0 : i32
    %c0_i32_0 = arith.constant 0 : i32
    return %arg0, %c0_i32, %arg1 : i32, i32, i32
  }
  func.func @transform_1(%arg0: i32, %arg1: i32) -> (i32, i32, i32) {
    %c0_i32 = arith.constant 0 : i32
    %c0_i32_0 = arith.constant 0 : i32
    %c0_i32_1 = arith.constant 0 : i32
    return %arg0, %c0_i32, %c0_i32_0 : i32, i32, i32
  }
  func.func @transform_2(%arg0: i32, %arg1: i32) -> (i32, i32, i32) {
    %c0_i32 = arith.constant 0 : i32
    %c0_i32_0 = arith.constant 0 : i32
    %c0_i32_1 = arith.constant 0 : i32
    return %arg0, %c0_i32, %c0_i32_0 : i32, i32, i32
  }
  func.func @transform_3(%arg0: i32, %arg1: i32) -> (i32, i32, i32) {
    %c0_i32 = arith.constant 0 : i32
    %c0_i32_0 = arith.constant 0 : i32
    %c0_i32_1 = arith.constant 0 : i32
    return %arg0, %c0_i32, %c0_i32_0 : i32, i32, i32
  }
  func.func @transform_4(%arg0: i32, %arg1: i32) -> (i32, i32) {
    %c0_i32 = arith.constant 0 : i32
    %c0_i32_0 = arith.constant 0 : i32
    %c0_i32_1 = arith.constant 0 : i32
    return %c0_i32, %c0_i32_0 : i32, i32
  }
  func.func @transform_5(%arg0: i32, %arg1: i32) -> (i32, i32) {
    %c0_i32 = arith.constant 0 : i32
    %c0_i32_0 = arith.constant 0 : i32
    %c0_i32_1 = arith.constant 0 : i32
    return %c0_i32, %c0_i32_0 : i32, i32
  }
  func.func @transform_6(%arg0: i32, %arg1: i32) -> (i32, i32) {
    %c0_i32 = arith.constant 0 : i32
    %c0_i32_0 = arith.constant 0 : i32
    %c0_i32_1 = arith.constant 0 : i32
    return %c0_i32, %c0_i32_0 : i32, i32
  }
  func.func @transform_7(%arg0: i32, %arg1: i32) -> (i32, i32) {
    %c0_i32 = arith.constant 0 : i32
    %c0_i32_0 = arith.constant 0 : i32
    %c0_i32_1 = arith.constant 0 : i32
    return %c0_i32, %c0_i32_0 : i32, i32
  }
  func.func @transform_8(%arg0: i32, %arg1: i32) -> (i32, i32) {
    %c0_i32 = arith.constant 0 : i32
    %c0_i32_0 = arith.constant 0 : i32
    %c0_i32_1 = arith.constant 0 : i32
    return %c0_i32, %c0_i32_0 : i32, i32
  }
  func.func @transform_9(%arg0: i32, %arg1: i32) -> (i32, i32) {
    %c0_i32 = arith.constant 0 : i32
    %c0_i32_0 = arith.constant 0 : i32
    %c0_i32_1 = arith.constant 0 : i32
    return %c0_i32, %c0_i32_0 : i32, i32
  }
  func.func @transform_10(%arg0: i32, %arg1: i32) -> (i32, i32) {
    %c0_i32 = arith.constant 0 : i32
    %c0_i32_0 = arith.constant 0 : i32
    %c0_i32_1 = arith.constant 0 : i32
    return %c0_i32, %c0_i32_0 : i32, i32
  }
  func.func @transform_11(%arg0: i32, %arg1: i32) -> (i32, i32) {
    %c0_i32 = arith.constant 0 : i32
    %c0_i32_0 = arith.constant 0 : i32
    %c0_i32_1 = arith.constant 0 : i32
    return %c0_i32, %c0_i32_0 : i32, i32
  }
  func.func @transform_12(%arg0: i32, %arg1: i32) -> (i32, i32) {
    %c0_i32 = arith.constant 0 : i32
    %c0_i32_0 = arith.constant 0 : i32
    %c0_i32_1 = arith.constant 0 : i32
    return %c0_i32, %c0_i32_0 : i32, i32
  }
  func.func @transform_13(%arg0: i32, %arg1: i32) -> (i32, i32) {
    %c0_i32 = arith.constant 0 : i32
    %c0_i32_0 = arith.constant 0 : i32
    %c0_i32_1 = arith.constant 0 : i32
    return %c0_i32, %c0_i32_0 : i32, i32
  }
  func.func @transform_14(%arg0: i32, %arg1: i32) -> (i32, i32) {
    %c0_i32 = arith.constant 0 : i32
    %c0_i32_0 = arith.constant 0 : i32
    %c0_i32_1 = arith.constant 0 : i32
    return %c0_i32, %c0_i32_0 : i32, i32
  }
  func.func @transform_15(%arg0: i32, %arg1: i32) -> (i32, i32) {
    %c0_i32 = arith.constant 0 : i32
    %c0_i32_0 = arith.constant 0 : i32
    %c0_i32_1 = arith.constant 0 : i32
    return %c0_i32, %c0_i32_0 : i32, i32
  }
  func.func @transform_16(%arg0: i32, %arg1: i32) -> (i32, i32, i32) {
    %c0_i32 = arith.constant 0 : i32
    %c0_i32_0 = arith.constant 0 : i32
    %c0_i32_1 = arith.constant 0 : i32
    return %arg0, %c0_i32, %c0_i32_0 : i32, i32, i32
  }
}

</mosaic_0001>

<bundles_post_ra>
// kernel: bert_forward.7
= control target key start
LH: loop header
LB: loop body
LE: loop exit
PB: predicated region body
PF: predicated region fallthrough
CT: control target
= control target key end

     0   :  { %vm34_vm0 = vcmask 261120   ;;  %s538_s0 = inlined_call_operand.vmem [shape: f32[16,32], index: 0, kind: input, shape index: {}]   ;;  %s539_s1 = inlined_call_operand.vmem [shape: f32[1,32], index: 1, kind: input, shape index: {}]   ;;  %s540_s2 = inlined_call_operand.vmem [shape: f32[1,32], index: 2, kind: input, shape index: {}]   ;;  %s541_s3 = inlined_call_operand.vmem [shape: bf16[32,128], index: 3, kind: input, shape index: {}]   ;;  %s542_s4 = inlined_call_operand.vmem [shape: f32[1,128], index: 4, kind: input, shape index: {}]   ;;  %s543_s5 = inlined_call_operand.vmem [shape: bf16[128,32], index: 5, kind: input, shape index: {}]   ;;  %s544_s6 = inlined_call_operand.vmem [shape: f32[1,32], index: 6, kind: input, shape index: {}]   ;;  %s545_s7 = inlined_call_operand.hbm [shape: f32[16,32], index: 7, kind: output, shape index: {}]  }
   0x1   :  { %v28_v0 = vld [vmem:[%s538_s0] sm:$0xff]  ;;  %v29_v3 = vld [vmem:[%s538_s0 + $0x8] sm:$0xff] }
   0x2   :  { %v378_v1 = vld [vmem:[%s544_s6] ss:$0 sm:$0xff]  ;;  %v35_v2 = vsel %vm34_vm0, %v28_v0, 0.0 }
   0x3   :  { %v141_v4 = vadd.f32 %v378_v1, %v28_v0  ;;  %36 = vadd.xlane.f32.xlu0 %v35_v2  ;;  %v142_v5 = vadd.f32 %v378_v1, %v29_v3 }
   0x4   :  { %12 = vsyncpa [#allocation5], 0  ;;  %v38_v6 = vsel %vm34_vm0, %v29_v3, 0.0  ;;  %v422_v7 = vmov 32.0   ;;  %v365_v38 = vld [vmem:[%s541_s3 + $0x8] sm:$0xff]  ;;  %v364_v41 = vld [vmem:[%s541_s3] sm:$0xff] }
   0x5   :  { %143 = vst.msk [vmem:[#allocation3] sm:$0xff] %vm34_vm0, %v141_v4  ;;  %382 = vrcp.f32 %v422_v7  ;;  %182 = vmatpush.bf16.msra.mxu0 %v365_v38  ;;  %v379_v58 = vld [vmem:[%s539_s1] ss:$0 sm:$0xff]  ;;  %vm134_vm11 = vcmask 257024   ;;  %s306_s0 = sshll.u32 %s545_s7, 4  ;;  %s424_s6 = smov 128   ;;  %s307_s0 = int_to_ptr.hbm [resolvable:$true] %s306_s0 }
   0x6   :  { %144 = vst.msk [vmem:[#allocation3 + $0x8] sm:$0xff] %vm34_vm0, %v142_v5  ;;  %v380_v2 = vld [vmem:[%s540_s2] ss:$0 sm:$0xff]  ;;  %s425_s30 = smov 8  }
   0x9   :  { %183 = vmatpush.bf16.msra.mxu0 %v364_v41 }
   0xb   :  { %39 = vadd.xlane.f32.xlu0 %v38_v6  ;;  %v383_v8 = vpop.eup %382 }
   0xc   :  { %v42_v9 = vmul.f32 32.0, %v383_v8  ;;  %vm46_vm1 = vweird.f32 %v383_v8 }
   0xe   :  { %v43_v10 = vsub.f32 1.0, %v42_v9 }
  0x10   :  { %v44_v11 = vmul.f32 %v383_v8, %v43_v10 }
  0x12   :  { %v45_v12 = vadd.f32 %v383_v8, %v44_v11 }
  0x14   :  { %v47_v13 = vsel %vm46_vm1, %v383_v8, %v45_v12 }
  0x76   :  { %v37_v14 = vpop.xlane.xlu0 %36 }
  0x77   :  { %v48_v15 = vmul.f32 %v47_v13, %v37_v14 }
  0x79   :  { %v479_v16 = vsub.f32 %v28_v0, %v48_v15 }
  0x7b   :  { %v52_v17 = vmul.f32 %v479_v16, %v479_v16  ;;  %v68_v0 = vmul.f32 %v379_v58, %v479_v16 }
  0x7d   :  { %v54_v18 = vsel %vm34_vm0, %v52_v17, 0.0 }
  0x7e   :  { %55 = vadd.xlane.f32.xlu1 %v54_v18  ;;  %v40_v19 = vpop.xlane.xlu0 %39 }
  0x7f   :  { %v49_v20 = vmul.f32 %v47_v13, %v40_v19 }
  0x81   :  { %v484_v21 = vsub.f32 %v29_v3, %v49_v20 }
  0x83   :  { %v53_v22 = vmul.f32 %v484_v21, %v484_v21  ;;  %v69_v14 = vmul.f32 %v379_v58, %v484_v21  ;;  %v371_v21 = vld [vmem:[%s543_s5 + $0x28] sm:$0xff] }
  0x85   :  { %v57_v23 = vsel %vm34_vm0, %v53_v22, 0.0  ;;  %v373_v22 = vld [vmem:[%s543_s5 + $0x38] sm:$0xff] }
  0x86   :  { %58 = vadd.xlane.f32.xlu1 %v57_v23  ;;  %275 = vmatpush.bf16.msra.mxu1 %v373_v22  ;;  %v372_v23 = vld [vmem:[%s543_s5 + $0x30] sm:$0xff] }
  0x8a   :  { %276 = vmatpush.bf16.msra.mxu1 %v372_v23 }
  0x8e   :  { %277 = vmatpush.bf16.msra.mxu1 %v371_v21 }
  0xf1   :  { %v56_v24 = vpop.xlane.xlu1 %55 }
  0xf2   :  { %v60_v25 = vmul.f32 %v56_v24, %v47_v13  ;;  %v370_v24 = vld [vmem:[%s543_s5 + $0x20] sm:$0xff] }
  0xf3   :  { %278 = vmatpush.bf16.msra.mxu1 %v370_v24 }
  0xf4   :  { %v62_v26 = vmul.f32 1.032258, %v60_v25  ;;  %v369_v25 = vld [vmem:[%s543_s5 + $0x18] sm:$0xff] }
  0xf6   :  { %384 = vrsqrt.f32 %v62_v26  ;;  %vm77_vm2 = vcmp.eq.f32.partialorder %v62_v26, inf  ;;  %v80_v42 = vand.u32 2147483648, %v62_v26  ;;  %vm79_vm3 = vcmp.eq.f32.partialorder %v62_v26, 0.0 }
  0xf7   :  { %279 = vmatpush.bf16.msra.mxu1 %v369_v25 }
  0xf9   :  { %v59_v27 = vpop.xlane.xlu1 %58 }
  0xfa   :  { %v61_v28 = vmul.f32 %v59_v27, %v47_v13  ;;  %v367_v27 = vld [vmem:[%s543_s5 + $0x8] sm:$0xff] }
  0xfc   :  { %v385_v29 = vpop.eup %384  ;;  %v63_v30 = vmul.f32 1.032258, %v61_v28  ;;  %v366_v28 = vld [vmem:[%s543_s5] sm:$0xff] }
  0xfd   :  { %v71_v31 = vmul.f32 %v385_v29, %v62_v26 }
  0xfe   :  { %386 = vrsqrt.f32 %v63_v30  ;;  %vm89_vm4 = vcmp.eq.f32.partialorder %v63_v30, inf  ;;  %v92_v50 = vand.u32 2147483648, %v63_v30  ;;  %vm91_vm5 = vcmp.eq.f32.partialorder %v63_v30, 0.0 }
  0xff   :  { %v72_v32 = vmul.f32 %v385_v29, %v71_v31 }
 0x101   :  { %v73_v33 = vmul.f32 0.5, %v72_v32 }
 0x103   :  { %v74_v34 = vsub.f32 1.5, %v73_v33 }
 0x104   :  { %v387_v35 = vpop.eup %386 }
 0x105   :  { %v75_v36 = vmul.f32 %v385_v29, %v74_v34  ;;  %v83_v37 = vmul.f32 %v387_v35, %v63_v30  ;;  %v381_v29 = vld [vmem:[%s542_s4] ss:$0 sm:$0xff]  ;;  %s423_s4 = smov [#allocation4]  }
 0x107   :  { %v76_v39 = vmul.f32 %v75_v36, %v62_v26  ;;  %v84_v40 = vmul.f32 %v387_v35, %v83_v37 }
 0x109   :  { %v78_v43 = vsel %vm77_vm2, %v62_v26, %v76_v39  ;;  %v85_v44 = vmul.f32 0.5, %v84_v40  ;;  %v368_v26 = vld [vmem:[%s543_s5 + $0x10] sm:$0xff]  ;;  %s304_s5 = sshll.u32 %s423_s4, 4  ;;  %s305_s5 = int_to_ptr.vmem [resolvable:$true] %s304_s5 }
 0x10a   :  { %v81_v45 = vsel %vm79_vm3, %v80_v42, %v78_v43  ;;  %280 = vmatpush.bf16.msra.mxu1 %v368_v26 }
 0x10b   :  { %v94_v46 = vadd.f32 1e-06, %v81_v45  ;;  %v86_v47 = vsub.f32 1.5, %v85_v44 }
 0x10d   :  { %388 = vrcp.f32 %v94_v46  ;;  %v87_v48 = vmul.f32 %v387_v35, %v86_v47  ;;  %v107_v57 = vand.u32 2147483648, %v94_v46  ;;  %v105_v60 = vand.u32 2147483647, %v94_v46 }
 0x10e   :  { %vm101_vm7 = vweird.f32 %v94_v46  ;;  %281 = vmatpush.bf16.msra.mxu1 %v367_v27 }
 0x10f   :  { %v88_v49 = vmul.f32 %v87_v48, %v63_v30  ;;  %v108_v62 = vor.u32 1.1754944e-38, %v107_v57  ;;  %vm106_vm9 = vcmp.eq.f32.partialorder %v105_v60, 8.507059e+37 }
 0x111   :  { %v90_v51 = vsel %vm89_vm4, %v63_v30, %v88_v49 }
 0x112   :  { %v93_v53 = vsel %vm91_vm5, %v92_v50, %v90_v51  ;;  %282 = vmatpush.bf16.msra.mxu1 %v366_v28 }
 0x113   :  { %v389_v52 = vpop.eup %388  ;;  %v95_v55 = vadd.f32 1e-06, %v93_v53  ;;  %v208_v53 = vld [vmem:[#allocation3] sm:$0xff] }
 0x114   :  { %v97_v54 = vmul.f32 %v389_v52, %v94_v46  ;;  %vm102_vm6 = vweird.f32 %v389_v52 }
 0x115   :  { %390 = vrcp.f32 %v95_v55  ;;  %vm103_vm8 = vmor %vm101_vm7, %vm102_vm6  ;;  %v122_v7 = vand.u32 2147483648, %v95_v55  ;;  %v120_v10 = vand.u32 2147483647, %v95_v55  ;;  %vm116_vm12 = vweird.f32 %v95_v55 }
 0x116   :  { %v98_v56 = vsub.f32 1.0, %v97_v54 }
 0x117   :  { %v123_v13 = vor.u32 1.1754944e-38, %v122_v7  ;;  %vm121_vm14 = vcmp.eq.f32.partialorder %v120_v10, 8.507059e+37 }
 0x118   :  { %v99_v59 = vmul.f32 %v389_v52, %v98_v56  ;;  %v209_v56 = vld [vmem:[#allocation3 + $0x8] sm:$0xff] }
 0x11a   :  { %v100_v61 = vadd.f32 %v389_v52, %v99_v59 }
 0x11b   :  { %v391_v63 = vpop.eup %390 }
 0x11c   :  { %v104_v1 = vsel %vm103_vm8, %v389_v52, %v100_v61  ;;  %v112_v3 = vmul.f32 %v391_v63, %v95_v55  ;;  %vm117_vm10 = vweird.f32 %v391_v63 }
 0x11d   :  { %v109_v4 = vsel %vm106_vm9, %v108_v62, %v104_v1  ;;  %vm118_vm13 = vmor %vm116_vm12, %vm117_vm10 }
 0x11e   :  { %v110_v5 = vmul.f32 %v109_v4, %v68_v0  ;;  %v113_v6 = vsub.f32 1.0, %v112_v3 }
 0x120   :  { %v130_v8 = vadd.f32 %v380_v2, %v110_v5  ;;  %v114_v9 = vmul.f32 %v391_v63, %v113_v6 }
 0x122   :  { %v132_v11 = vpack.c.bf16 %v130_v8, %v130_v8  ;;  %v115_v12 = vadd.f32 %v391_v63, %v114_v9 }
 0x124   :  { %135 = vst.msk [vmem:[#allocation2] sm:$0xf] %vm134_vm11, %v132_v11  ;;  %v119_v15 = vsel %vm118_vm13, %v391_v63, %v115_v12 }
 0x125   :  { %v124_v16 = vsel %vm121_vm14, %v123_v13, %v119_v15 }
 0x126   :  { %v125_v17 = vmul.f32 %v124_v16, %v69_v14 }
 0x128   :  { %v131_v18 = vadd.f32 %v380_v2, %v125_v17 }
 0x12a   :  { %v133_v19 = vpack.c.bf16 %v131_v18, %v131_v18 }
 0x12c   :  { %136 = vst.msk [vmem:[#allocation2 + $0x4] sm:$0xf] %vm134_vm11, %v133_v19 }
 0x133   :  { %v363_v20 = vld [vmem:[#allocation2] sm:$0xff] }
 0x134   :  { %330 = vmatmul.msk.bf16.vlgmr.msra.gmra.mxu0 %vm34_vm0, %v363_v20 }
 0x1b1   :  { %v185_v30 = vpop.f32.mrf.mxu0 }
 0x1b2   :  { %v186_v31 = vadd.f32 %v381_v29, %v185_v30 }
 0x1b4   :  { %v192_v32 = vmul.f32 %v186_v31, %v186_v31  ;;  %v190_v47 = vmul.f32 0.5, %v186_v31 }
 0x1b6   :  { %v194_v33 = vmul.f32 %v192_v32, %v186_v31 }
 0x1b8   :  { %v196_v34 = vmul.f32 0.044715, %v194_v33 }
 0x1b9   :  { %v187_v35 = vpop.f32.mrf.mxu0 }
 0x1ba   :  { %v188_v36 = vadd.f32 %v381_v29, %v187_v35  ;;  %v198_v37 = vadd.f32 %v196_v34, %v186_v31 }
 0x1bc   :  { %v193_v38 = vmul.f32 %v188_v36, %v188_v36  ;;  %v200_v40 = vmul.f32 0.7978846, %v198_v37  ;;  %v191_v48 = vmul.f32 0.5, %v188_v36 }
 0x1be   :  { %v195_v39 = vmul.f32 %v193_v38, %v188_v36  ;;  %392 = vtanh.f32 %v200_v40 }
 0x1c0   :  { %v197_v41 = vmul.f32 0.044715, %v195_v39 }
 0x1c2   :  { %v199_v42 = vadd.f32 %v197_v41, %v188_v36 }
 0x1c4   :  { %v201_v43 = vmul.f32 0.7978846, %v199_v42  ;;  %v393_v44 = vpop.eup %392 }
 0x1c5   :  { %v204_v45 = vadd.f32 1.0, %v393_v44 }
 0x1c6   :  { %394 = vtanh.f32 %v201_v43 }
 0x1c7   :  { %v206_v50 = vmul.f32 %v204_v45, %v190_v47 }
 0x1cc   :  { %v395_v46 = vpop.eup %394 }
 0x1cd   :  { %v205_v49 = vadd.f32 1.0, %v395_v46 }
 0x1cf   :  { %v207_v51 = vmul.f32 %v205_v49, %v191_v48 }
 0x1d1   :  { %v210_v52 = vpack.c.bf16 %v207_v51, %v206_v50 }
 0x1d3   :  { %283 = vmatmul.bf16.vlgmr.msra.gmra.mxu1 %v210_v52 }
 0x250   :  { %v284_v54 = vpop.f32.mrf.mxu1 }
 0x251   :  { %v289_v55 = vadd.f32 %v284_v54, %v208_v53 }
 0x253   :  { %291 = vst.msk [vmem:[#allocation3] sm:$0xff] %vm34_vm0, %v289_v55 }
 0x258   :  { %v286_v57 = vpop.f32.mrf.mxu1 }
 0x259   :  { %v290_v58 = vadd.f32 %v286_v57, %v209_v56 }
 0x25a   :  { %v296_v59 = vld [vmem:[#allocation3] sm:$0xff] }
 0x25b   :  { %292 = vst.msk [vmem:[#allocation3 + $0x8] sm:$0xff] %vm34_vm0, %v290_v58 }
 0x25c   :  { %298 = vst.msk [vmem:[#allocation4] sm:$0xff] %vm34_vm0, %v296_v59 }
 0x262   :  { %v297_v60 = vld [vmem:[#allocation3 + $0x8] sm:$0xff] }
 0x263   :  { %299 = vst.msk [vmem:[#allocation4 + $0x8] sm:$0xff] %vm34_vm0, %v297_v60 }
 0x264   :  { %312 = dma.vmem_to_hbm [thread:$0]  %s305_s5, 256, %s307_s0, [#allocation5], %s424_s6, %s424_s6, %s425_s30  }
 0x265   :  { %420 = dma.done.wait [#allocation5], 256  }
 0x266   :  { %421 = vsyncadd [#allocation5], 4294967040 }
 0x267   :  { %317 = vsyncpa [#allocation5], 1 }

// kernel: bert_forward.5
= control target key start
LH: loop header
LB: loop body
LE: loop exit
PB: predicated region body
PF: predicated region fallthrough
CT: control target
= control target key end

     0   :  { %vm33_vm0 = vcmask 261120   ;;  %v378_v7 = vmov 32.0   ;;  %vm133_vm11 = vcmask 257024   ;;  %s490_s0 = inlined_call_operand.vmem [shape: f32[16,32], index: 0, kind: input, shape index: {}]   ;;  %s491_s6 = inlined_call_operand.vmem [shape: f32[1,32], index: 6, kind: input, shape index: {}]   ;;  %s492_s1 = inlined_call_operand.vmem [shape: f32[1,32], index: 1, kind: input, shape index: {}]   ;;  %s493_s2 = inlined_call_operand.vmem [shape: f32[1,32], index: 2, kind: input, shape index: {}]   ;;  %s494_s4 = inlined_call_operand.vmem [shape: f32[1,128], index: 4, kind: input, shape index: {}]   ;;  %s495_s3 = inlined_call_operand.vmem [shape: bf16[32,128], index: 3, kind: input, shape index: {}]   ;;  %s496_s5 = inlined_call_operand.vmem [shape: bf16[128,32], index: 5, kind: input, shape index: {}]   ;;  %s497_s7 = inlined_call_operand.vmem [shape: f32[16,32], index: 7, kind: output, shape index: {}]  }
   0x1   :  { %v27_v0 = vld [vmem:[%s490_s0] sm:$0xff]  ;;  %v28_v3 = vld [vmem:[%s490_s0 + $0x8] sm:$0xff]  ;;  %364 = vrcp.f32 %v378_v7 }
   0x2   :  { %v360_v1 = vld [vmem:[%s491_s6] ss:$0 sm:$0xff]  ;;  %v34_v2 = vsel %vm33_vm0, %v27_v0, 0.0  ;;  %v37_v6 = vsel %vm33_vm0, %v28_v3, 0.0  ;;  %v350_v41 = vld [vmem:[%s495_s3 + $0x8] sm:$0xff] }
   0x3   :  { %v140_v4 = vadd.f32 %v360_v1, %v27_v0  ;;  %35 = vadd.xlane.f32.xlu0 %v34_v2  ;;  %v141_v5 = vadd.f32 %v360_v1, %v28_v3  ;;  %v361_v15 = vld [vmem:[%s492_s1] ss:$0 sm:$0xff]  ;;  %181 = vmatpush.bf16.msra.mxu0 %v350_v41 }
   0x4   :  { %v349_v44 = vld [vmem:[%s495_s3] sm:$0xff] }
   0x5   :  { %142 = vst.msk [vmem:[#allocation3] sm:$0xff] %vm33_vm0, %v140_v4 }
   0x6   :  { %143 = vst.msk [vmem:[#allocation3 + $0x8] sm:$0xff] %vm33_vm0, %v141_v5 }
   0x7   :  { %v365_v8 = vpop.eup %364  ;;  %182 = vmatpush.bf16.msra.mxu0 %v349_v44 }
   0x8   :  { %v41_v9 = vmul.f32 32.0, %v365_v8  ;;  %vm45_vm1 = vweird.f32 %v365_v8 }
   0xa   :  { %v42_v10 = vsub.f32 1.0, %v41_v9 }
   0xb   :  { %38 = vadd.xlane.f32.xlu0 %v37_v6 }
   0xc   :  { %v43_v11 = vmul.f32 %v365_v8, %v42_v10 }
   0xe   :  { %v44_v12 = vadd.f32 %v365_v8, %v43_v11 }
  0x10   :  { %v46_v13 = vsel %vm45_vm1, %v365_v8, %v44_v12 }
  0x76   :  { %v36_v14 = vpop.xlane.xlu0 %35 }
  0x77   :  { %v47_v16 = vmul.f32 %v46_v13, %v36_v14 }
  0x79   :  { %v49_v17 = vsub.f32 %v27_v0, %v47_v16 }
  0x7b   :  { %v435_v18 = vmul.f32 %v361_v15, %v49_v17  ;;  %v51_v19 = vmul.f32 %v49_v17, %v49_v17 }
  0x7d   :  { %v53_v20 = vsel %vm33_vm0, %v51_v19, 0.0 }
  0x7e   :  { %54 = vadd.xlane.f32.xlu1 %v53_v20  ;;  %v39_v21 = vpop.xlane.xlu0 %38 }
  0x7f   :  { %v48_v22 = vmul.f32 %v46_v13, %v39_v21  ;;  %v358_v21 = vld [vmem:[%s496_s5 + $0x38] sm:$0xff] }
  0x80   :  { %274 = vmatpush.bf16.msra.mxu1 %v358_v21 }
  0x81   :  { %v50_v23 = vsub.f32 %v28_v3, %v48_v22  ;;  %v362_v3 = vld [vmem:[%s493_s2] ss:$0 sm:$0xff]  ;;  %v357_v22 = vld [vmem:[%s496_s5 + $0x30] sm:$0xff] }
  0x83   :  { %v438_v24 = vmul.f32 %v361_v15, %v50_v23  ;;  %v52_v25 = vmul.f32 %v50_v23, %v50_v23  ;;  %v356_v23 = vld [vmem:[%s496_s5 + $0x28] sm:$0xff] }
  0x84   :  { %275 = vmatpush.bf16.msra.mxu1 %v357_v22 }
  0x85   :  { %v56_v26 = vsel %vm33_vm0, %v52_v25, 0.0  ;;  %v354_v25 = vld [vmem:[%s496_s5 + $0x18] sm:$0xff] }
  0x86   :  { %57 = vadd.xlane.f32.xlu1 %v56_v26  ;;  %v353_v26 = vld [vmem:[%s496_s5 + $0x10] sm:$0xff] }
  0x88   :  { %276 = vmatpush.bf16.msra.mxu1 %v356_v23 }
  0xf1   :  { %v55_v27 = vpop.xlane.xlu1 %54 }
  0xf2   :  { %v59_v28 = vmul.f32 %v55_v27, %v46_v13  ;;  %v352_v27 = vld [vmem:[%s496_s5 + $0x8] sm:$0xff] }
  0xf4   :  { %v61_v29 = vmul.f32 1.032258, %v59_v28  ;;  %v351_v28 = vld [vmem:[%s496_s5] sm:$0xff] }
  0xf6   :  { %366 = vrsqrt.f32 %v61_v29  ;;  %vm76_vm2 = vcmp.eq.f32.partialorder %v61_v29, inf  ;;  %v79_v45 = vand.u32 2147483648, %v61_v29  ;;  %vm78_vm3 = vcmp.eq.f32.partialorder %v61_v29, 0.0 }
  0xf9   :  { %v58_v30 = vpop.xlane.xlu1 %57 }
  0xfa   :  { %v60_v31 = vmul.f32 %v58_v30, %v46_v13 }
  0xfc   :  { %v367_v32 = vpop.eup %366  ;;  %v62_v33 = vmul.f32 1.032258, %v60_v31 }
  0xfd   :  { %v70_v34 = vmul.f32 %v367_v32, %v61_v29 }
  0xfe   :  { %368 = vrsqrt.f32 %v62_v33  ;;  %vm88_vm4 = vcmp.eq.f32.partialorder %v62_v33, inf  ;;  %v91_v53 = vand.u32 2147483648, %v62_v33  ;;  %vm90_vm5 = vcmp.eq.f32.partialorder %v62_v33, 0.0 }
  0xff   :  { %v71_v35 = vmul.f32 %v367_v32, %v70_v34 }
 0x101   :  { %v72_v36 = vmul.f32 0.5, %v71_v35 }
 0x103   :  { %v73_v37 = vsub.f32 1.5, %v72_v36 }
 0x104   :  { %v369_v38 = vpop.eup %368 }
 0x105   :  { %v74_v39 = vmul.f32 %v367_v32, %v73_v37  ;;  %v82_v40 = vmul.f32 %v369_v38, %v62_v33 }
 0x107   :  { %v75_v42 = vmul.f32 %v74_v39, %v61_v29  ;;  %v83_v43 = vmul.f32 %v369_v38, %v82_v40 }
 0x109   :  { %v77_v46 = vsel %vm76_vm2, %v61_v29, %v75_v42  ;;  %v84_v47 = vmul.f32 0.5, %v83_v43  ;;  %v363_v29 = vld [vmem:[%s494_s4] ss:$0 sm:$0xff] }
 0x10a   :  { %v80_v48 = vsel %vm78_vm3, %v79_v45, %v77_v46 }
 0x10b   :  { %v93_v49 = vadd.f32 1e-06, %v80_v48  ;;  %v85_v50 = vsub.f32 1.5, %v84_v47 }
 0x10d   :  { %370 = vrcp.f32 %v93_v49  ;;  %v86_v51 = vmul.f32 %v369_v38, %v85_v50  ;;  %v106_v60 = vand.u32 2147483648, %v93_v49  ;;  %v104_v62 = vand.u32 2147483647, %v93_v49 }
 0x10e   :  { %vm100_vm7 = vweird.f32 %v93_v49 }
 0x10f   :  { %v87_v52 = vmul.f32 %v86_v51, %v62_v33  ;;  %v107_v0 = vor.u32 1.1754944e-38, %v106_v60  ;;  %vm105_vm9 = vcmp.eq.f32.partialorder %v104_v62, 8.507059e+37 }
 0x111   :  { %v89_v54 = vsel %vm88_vm4, %v62_v33, %v87_v52 }
 0x112   :  { %v92_v56 = vsel %vm90_vm5, %v91_v53, %v89_v54  ;;  %v207_v53 = vld [vmem:[#allocation3] sm:$0xff] }
 0x113   :  { %v371_v55 = vpop.eup %370  ;;  %v94_v58 = vadd.f32 1e-06, %v92_v56  ;;  %v208_v56 = vld [vmem:[#allocation3 + $0x8] sm:$0xff] }
 0x114   :  { %v96_v57 = vmul.f32 %v371_v55, %v93_v49  ;;  %vm101_vm6 = vweird.f32 %v371_v55 }
 0x115   :  { %372 = vrcp.f32 %v94_v58  ;;  %vm102_vm8 = vmor %vm100_vm7, %vm101_vm6  ;;  %v121_v8 = vand.u32 2147483648, %v94_v58  ;;  %v119_v11 = vand.u32 2147483647, %v94_v58  ;;  %vm115_vm12 = vweird.f32 %v94_v58 }
 0x116   :  { %v97_v59 = vsub.f32 1.0, %v96_v57 }
 0x117   :  { %v122_v14 = vor.u32 1.1754944e-38, %v121_v8  ;;  %vm120_vm14 = vcmp.eq.f32.partialorder %v119_v11, 8.507059e+37 }
 0x118   :  { %v98_v61 = vmul.f32 %v371_v55, %v97_v59 }
 0x11a   :  { %v99_v63 = vadd.f32 %v371_v55, %v98_v61 }
 0x11b   :  { %v373_v1 = vpop.eup %372 }
 0x11c   :  { %v103_v2 = vsel %vm102_vm8, %v371_v55, %v99_v63  ;;  %v111_v4 = vmul.f32 %v373_v1, %v94_v58  ;;  %vm116_vm10 = vweird.f32 %v373_v1 }
 0x11d   :  { %v108_v5 = vsel %vm105_vm9, %v107_v0, %v103_v2  ;;  %vm117_vm13 = vmor %vm115_vm12, %vm116_vm10 }
 0x11e   :  { %v109_v6 = vmul.f32 %v108_v5, %v435_v18  ;;  %v112_v7 = vsub.f32 1.0, %v111_v4 }
 0x120   :  { %v129_v9 = vadd.f32 %v362_v3, %v109_v6  ;;  %v113_v10 = vmul.f32 %v373_v1, %v112_v7 }
 0x122   :  { %v131_v12 = vpack.c.bf16 %v129_v9, %v129_v9  ;;  %v114_v13 = vadd.f32 %v373_v1, %v113_v10 }
 0x124   :  { %134 = vst.msk [vmem:[#allocation2] sm:$0xf] %vm133_vm11, %v131_v12  ;;  %v118_v15 = vsel %vm117_vm13, %v373_v1, %v114_v13 }
 0x125   :  { %v123_v16 = vsel %vm120_vm14, %v122_v14, %v118_v15 }
 0x126   :  { %v124_v17 = vmul.f32 %v123_v16, %v438_v24  ;;  %v355_v24 = vld [vmem:[%s496_s5 + $0x20] sm:$0xff] }
 0x127   :  { %277 = vmatpush.bf16.msra.mxu1 %v355_v24 }
 0x128   :  { %v130_v19 = vadd.f32 %v362_v3, %v124_v17 }
 0x12a   :  { %v132_v18 = vpack.c.bf16 %v130_v19, %v130_v19 }
 0x12b   :  { %278 = vmatpush.bf16.msra.mxu1 %v354_v25 }
 0x12c   :  { %135 = vst.msk [vmem:[#allocation2 + $0x4] sm:$0xf] %vm133_vm11, %v132_v18 }
 0x12f   :  { %279 = vmatpush.bf16.msra.mxu1 %v353_v26 }
 0x133   :  { %v348_v20 = vld [vmem:[#allocation2] sm:$0xff]  ;;  %280 = vmatpush.bf16.msra.mxu1 %v352_v27 }
 0x134   :  { %315 = vmatmul.msk.bf16.vlgmr.msra.gmra.mxu0 %vm33_vm0, %v348_v20 }
 0x137   :  { %281 = vmatpush.bf16.msra.mxu1 %v351_v28 }
 0x1b1   :  { %v184_v30 = vpop.f32.mrf.mxu0 }
 0x1b2   :  { %v185_v31 = vadd.f32 %v363_v29, %v184_v30 }
 0x1b4   :  { %v191_v32 = vmul.f32 %v185_v31, %v185_v31  ;;  %v189_v47 = vmul.f32 0.5, %v185_v31 }
 0x1b6   :  { %v193_v33 = vmul.f32 %v191_v32, %v185_v31 }
 0x1b8   :  { %v195_v34 = vmul.f32 0.044715, %v193_v33 }
 0x1b9   :  { %v186_v35 = vpop.f32.mrf.mxu0 }
 0x1ba   :  { %v187_v36 = vadd.f32 %v363_v29, %v186_v35  ;;  %v197_v37 = vadd.f32 %v195_v34, %v185_v31 }
 0x1bc   :  { %v192_v38 = vmul.f32 %v187_v36, %v187_v36  ;;  %v199_v40 = vmul.f32 0.7978846, %v197_v37  ;;  %v190_v48 = vmul.f32 0.5, %v187_v36 }
 0x1be   :  { %v194_v39 = vmul.f32 %v192_v38, %v187_v36  ;;  %374 = vtanh.f32 %v199_v40 }
 0x1c0   :  { %v196_v41 = vmul.f32 0.044715, %v194_v39 }
 0x1c2   :  { %v198_v42 = vadd.f32 %v196_v41, %v187_v36 }
 0x1c4   :  { %v200_v43 = vmul.f32 0.7978846, %v198_v42  ;;  %v375_v44 = vpop.eup %374 }
 0x1c5   :  { %v203_v45 = vadd.f32 1.0, %v375_v44 }
 0x1c6   :  { %376 = vtanh.f32 %v200_v43 }
 0x1c7   :  { %v205_v50 = vmul.f32 %v203_v45, %v189_v47 }
 0x1cc   :  { %v377_v46 = vpop.eup %376 }
 0x1cd   :  { %v204_v49 = vadd.f32 1.0, %v377_v46 }
 0x1cf   :  { %v206_v51 = vmul.f32 %v204_v49, %v190_v48 }
 0x1d1   :  { %v209_v52 = vpack.c.bf16 %v206_v51, %v205_v50 }
 0x1d3   :  { %282 = vmatmul.bf16.vlgmr.msra.gmra.mxu1 %v209_v52 }
 0x250   :  { %v283_v54 = vpop.f32.mrf.mxu1 }
 0x251   :  { %v288_v55 = vadd.f32 %v283_v54, %v207_v53 }
 0x253   :  { %290 = vst.msk [vmem:[#allocation3] sm:$0xff] %vm33_vm0, %v288_v55 }
 0x258   :  { %v285_v57 = vpop.f32.mrf.mxu1 }
 0x259   :  { %v289_v58 = vadd.f32 %v285_v57, %v208_v56 }
 0x25a   :  { %v295_v59 = vld [vmem:[#allocation3] sm:$0xff] }
 0x25b   :  { %297 = vst.msk [vmem:[%s497_s7] sm:$0xff] %vm33_vm0, %v295_v59 }
 0x25c   :  { %291 = vst.msk [vmem:[#allocation3 + $0x8] sm:$0xff] %vm33_vm0, %v289_v58 }
 0x263   :  { %v296_v60 = vld [vmem:[#allocation3 + $0x8] sm:$0xff] }
 0x264   :  { %298 = vst.msk [vmem:[%s497_s7 + $0x8] sm:$0xff] %vm33_vm0, %v296_v60 }

// kernel: bert_forward.4
= control target key start
LH: loop header
LB: loop body
LE: loop exit
PB: predicated region body
PF: predicated region fallthrough
CT: control target
= control target key end

     0   :  { %s1399_s21 = smov 0   ;;  %s1401_s22 = smov 0   ;;  %s1547_s0 = inlined_call_operand.vmem [shape: f32[2,1,8], index: 0, kind: input, shape index: {}]   ;;  %s1548_s1 = inlined_call_operand.vmem [shape: f32[2,8,32], index: 1, kind: input, shape index: {}]   ;;  %s1549_s2 = inlined_call_operand.vmem [shape: bf16[2,8,32], index: 2, kind: input, shape index: {}]   ;;  %s1550_s3 = inlined_call_operand.vmem [shape: f32[2,8,2], index: 3, kind: input, shape index: {}]   ;;  %s1551_s4 = inlined_call_operand.vmem [shape: bf16[32,32], index: 4, kind: input, shape index: {}]   ;;  %s1552_s5 = inlined_call_operand.vmem [shape: f32[2,32], index: 5, kind: input, shape index: {}]   ;;  %s1553_s6 = inlined_call_operand.vmem [shape: f32[1,32], index: 6, kind: input, shape index: {}]   ;;  %s1554_s7 = inlined_call_operand.vmem [shape: bf16[32,32], index: 7, kind: input, shape index: {}]   ;;  %s1555_s8 = inlined_call_operand.vmem [shape: f32[2,32], index: 8, kind: input, shape index: {}]   ;;  %s1556_s9 = inlined_call_operand.vmem [shape: f32[1,32], index: 9, kind: input, shape index: {}]   ;;  %s1557_s10 = inlined_call_operand.vmem [shape: bf16[32,32], index: 10, kind: input, shape index: {}]   ;;  %s1558_s11 = inlined_call_operand.vmem [shape: f32[1,32], index: 11, kind: input, shape index: {}]   ;;  %s1559_s12 = inlined_call_operand.vmem [shape: bf16[32,32], index: 12, kind: input, shape index: {}]   ;;  %s1560_s13 = inlined_call_operand.vmem [shape: f32[1,32], index: 13, kind: input, shape index: {}]   ;;  %s1561_s14 = inlined_call_operand.vmem [shape: f32[1,32], index: 14, kind: input, shape index: {}]   ;;  %s1562_s15 = inlined_call_operand.vmem [shape: f32[1,32], index: 15, kind: input, shape index: {}]   ;;  %s1563_s16 = inlined_call_operand.vmem [shape: f32[2,8,32], index: 16, kind: output, shape index: {}]  }
   0x1   :  { %1564 = sst [smem:[#allocation6_spill]] %s1547_s0  ;;  %s1403_s23 = smov 0  }
   0x2 LB: > { %s38_s24 = sadd.s32 1, %s1301_s22  ;;  %p1162_p0 = scmp.ge.s32.totalorder %s1305_s23, 1  ;;  %s1305_s23 = sphi %s1403_s23, %s26_s23   ;;  %s1301_s22 = sphi %s1401_s22, %s1567_s22   ;;  %s1297_s21 = sphi %s1399_s21, %s1566_s21  }
   0x3   : > { %p40_p1 = scmp.ge.s32.totalorder %s38_s24, 2  ;;  %p504_p2 = scmp.lt.s32.totalorder %s1305_s23, 3 }
   0x5   : > { %s1569_s24 = smov (%p40_p1, %s38_s24), 0  ;;  %p505_p3 = pnand %p1162_p0, %p504_p2 }
   0x6   : > { %p566_p4 = scmp.lt.s32.totalorder (!%p505_p3), %s1297_s21, 1  ;;  %s1310_s25 = smov (!%p505_p3), 112  }
   0x7   : > { %508 = sbr.rel (%p505_p3) target bundleno = 1193 (0x4a9), region = 84  ;;  %s1565_s27 = sld [smem:[#allocation6_spill]] (!%p505_p3) }
   0xc   : > { %v1212_v0 = vld [vmem:[%s1554_s7 + $0x8] sm:$0xff]  ;;  %v1307_v2 = vmov 0   ;;  %v1211_v3 = vld [vmem:[%s1554_s7] sm:$0xff]  ;;  %s1571_s21 = smov (!%p566_p4, %s1297_s21), 1  ;;  %vm619_vm0 = vcmask 261120   ;;  %v1308_v10 = vmov 1  }
   0xd   : > { %v1210_v1 = vld [vmem:[%s1551_s4 + $0x8] sm:$0xff]  ;;  %1250 = vset.pattern.permute.xlu1 %v1307_v2  ;;  %1248 = vset.pattern.permute.xlu0 %v1307_v2  ;;  %v1209_v4 = vld [vmem:[%s1551_s4] sm:$0xff]  ;;  %s1432_s18 = sshll.u32 %s1571_s21, 3  ;;  %s1164_s19 = sshll.u32 %s1571_s21, 2  ;;  %v1309_v11 = vmov 32.0   ;;  %vm826_vm2 = vcmask 130048  }
   0xe   : > { %703 = vmatpush.bf16.msra.mxu1 %v1212_v0  ;;  %629 = vmatpush.bf16.msra.mxu0 %v1210_v1  ;;  %s575_s26 = scalar_lea.vmem %s1548_s1, %s1432_s18  ;;  %s579_s29 = scalar_lea.vmem %s1549_s2, %s1164_s19  ;;  %1265 = vrcp.f32 %v1309_v11  ;;  %v1258_v23 = vld [vmem:[%s1552_s5] ss:$0 sm:$0xff]  ;;  %v1257_v26 = vld [vmem:[%s1555_s8 + $0x1] ss:$0 sm:$0xff]  ;;  %vm651_vm3 = vcmask 257024   ;;  %v1214_v56 = vld [vmem:[%s1557_s10 + $0x8] sm:$0xff] }
   0xf   : > { %1253 = vset.pattern.permute.xlu2 %v1307_v2  ;;  %v1439_v5 = vld [vmem:[%s575_s26] sm:$0xff]  ;;  %s583_s17 = scalar_lea.vmem %s1550_s3, %s1432_s18  ;;  %810 = vmatpush.bf16.msra.mxu2 %v1214_v56  ;;  %vm653_vm4 = vcmask 7168   ;;  %s571_s28 = scalar_lea.vmem %s1565_s27, %s1571_s21  ;;  %vm847_vm12 = vcmask 64512   ;;  %vm876_vm13 = vcmask 1043456  }
  0x10   : > { %v724_v6 = vsel %vm619_vm0, %v1439_v5, 0.0  ;;  %v666_v7 = vld [vmem:[%s579_s29] sm:$0xf]  ;;  %s1313_s21 = smov 16  }
  0x11   : > { %v668_v8 = vld [vmem:[%s583_s17] sm:$0xff]  ;;  %725 = vadd.xlane.f32.xlu2 %v724_v6 }
  0x12   : > { %704 = vmatpush.bf16.msra.mxu1 %v1211_v3  ;;  %630 = vmatpush.bf16.msra.mxu0 %v1209_v4  ;;  %v593_v9 = vld [vmem:[%s579_s29] sm:$0xf]  ;;  %v1311_v4 = vmov 0.0   ;;  %s587_s29 = scalar_lea.vmem %s1563_s16, %s1432_s18 }
  0x13   : > { %676 = vperm.xlu1 %1250, %v668_v8   ;;  %602 = vperm.xlu0 %1248, %v668_v8   ;;  %v1256_v25 = vld [vmem:[%s1555_s8] ss:$0 sm:$0xff]  ;;  %v1260_v28 = vld [vmem:[%s1552_s5 + $0x1] ss:$0 sm:$0xff]  ;;  %658 = vst.msk [vmem:[#allocation5] sm:$0xff] %vm619_vm0, %v1311_v4 }
  0x14   : > { %v1266_v12 = vpop.eup %1265  ;;  %v1259_v38 = vld [vmem:[%s1556_s9] ss:$0 sm:$0xff]  ;;  %656 = vst.msk [vmem:[#allocation4] sm:$0xff] %vm653_vm4, %v1311_v4 }
  0x15   : > { %1184 = vmatmul.msk.bf16.vlgmr.msra.gmra.mxu1 %vm619_vm0, %v666_v7  ;;  %1175 = vmatmul.msk.bf16.vlgmr.msra.gmra.mxu0 %vm619_vm0, %v593_v9  ;;  %v728_v13 = vmul.f32 32.0, %v1266_v12  ;;  %vm732_vm1 = vweird.f32 %v1266_v12  ;;  %v1261_v40 = vld [vmem:[%s1553_s6] ss:$0 sm:$0xff]  ;;  %657 = vst.msk [vmem:[#allocation4 + $0x8] sm:$0xff] %vm653_vm4, %v1311_v4 }
  0x16   : > { %v1213_v57 = vld [vmem:[%s1557_s10] sm:$0xff] }
  0x17   : > { %v729_v14 = vsub.f32 1.0, %v728_v13  ;;  %811 = vmatpush.bf16.msra.mxu2 %v1213_v57 }
  0x19   : > { %v730_v15 = vmul.f32 %v1266_v12, %v729_v14 }
  0x1b   : > { %1251 = vset.pattern.permute.xlu1 %v1308_v10  ;;  %1249 = vset.pattern.permute.xlu0 %v1308_v10  ;;  %v731_v16 = vadd.f32 %v1266_v12, %v730_v15 }
  0x1c   : > { %712 = vperm.xlu1 %1251, %v668_v8   ;;  %638 = vperm.xlu0 %1249, %v668_v8  }
  0x1d   : > { %v733_v17 = vsel %vm732_vm1, %v1266_v12, %v731_v16 }
  0x24   : > { %1252 = vset.pattern.permute.xlu1 %v1307_v2  ;;  %1254 = vset.pattern.permute.xlu0 %v1307_v2 }
  0x84   : > { %v726_v19 = vpop.xlane.xlu2 %725 }
  0x85   : > { %v677_v18 = vpop.permute.xlu1 %676  ;;  %v734_v20 = vmul.f32 %v733_v17, %v726_v19  ;;  %v603_v21 = vpop.permute.xlu0 %602 }
  0x86   : > { %v606_v30 = vmul.f32 %v1258_v23, %v603_v21  ;;  %v680_v31 = vmul.f32 %v1256_v25, %v677_v18  ;;  %v1255_v18 = vld [vmem:[%s1561_s14] ss:$0 sm:$0xff] }
  0x87   : > { %v1453_v22 = vsub.f32 %v1439_v5, %v734_v20 }
  0x89   : > { %v736_v24 = vmul.f32 %v1453_v22, %v1453_v22 }
  0x8b   : > { %v737_v27 = vsel %vm619_vm0, %v736_v24, 0.0  ;;  %v746_v24 = vmul.f32 %v1255_v18, %v1453_v22  ;;  %v863_v18 = vld [vmem:[#allocation4] sm:$0xff] }
  0x8c   : > { %738 = vadd.xlane.f32.xlu2 %v737_v27 }
  0x8e   : > { %v713_v29 = vpop.permute.xlu1 %712  ;;  %v639_v33 = vpop.permute.xlu0 %638 }
  0x8f   : > { %v716_v32 = vmul.f32 %v1257_v26, %v713_v29  ;;  %v642_v36 = vmul.f32 %v1260_v28, %v639_v33  ;;  %v1262_v26 = vld [vmem:[%s1562_s15] ss:$0 sm:$0xff] }
  0x92   : > { %v706_v34 = vpop.f32.mrf.mxu1  ;;  %v632_v35 = vpop.f32.mrf.mxu0 }
  0x93   : > { %v707_v37 = vadd.f32 %v706_v34, %v680_v31  ;;  %v633_v39 = vadd.f32 %v632_v35, %v606_v30 }
  0x95   : > { %v717_v41 = vadd.f32 %v716_v32, %v707_v37  ;;  %v643_v42 = vadd.f32 %v642_v36, %v633_v39  ;;  %v818_v32 = vld [vmem:[%s571_s28] sm:$0x1] }
  0x96   : > { %vm819_vm11 = vcmp.eq.f32.partialorder %v818_v32, 0.0  ;;  %v1263_v39 = vld [vmem:[%s1558_s11] ss:$0 sm:$0xff] }
  0x97   : > { %v722_v43 = vadd.f32 %v1259_v38, %v717_v41  ;;  %v648_v44 = vadd.f32 %v1261_v40, %v643_v42  ;;  %v820_v22 = vsel %vm819_vm11, -1e+09, %v1311_v4  ;;  %v1312_v38 = vmov -inf  }
  0x98   : > { %v824_v33 = vperm.slane %v820_v22, 0  ;;  %655 = vst.msk [vmem:[#allocation3 + $0x8] sm:$0xff] %vm653_vm4, %v1312_v38 }
  0x99   : > { %v723_v45 = vpack.c.bf16 %v722_v43, %v722_v43  ;;  %v649_v46 = vmul.f32 0.25, %v648_v44  ;;  %654 = vst.msk [vmem:[#allocation3] sm:$0xff] %vm653_vm4, %v1312_v38  ;;  %v1215_v38 = vld [vmem:[%s1559_s12] sm:$0xff] }
  0x9a   : > { %v708_v47 = vpop.f32.mrf.mxu1  ;;  %v634_v48 = vpop.f32.mrf.mxu0 }
  0x9b   : > { %v831_v49 = vsel %vm826_vm2, %v723_v45, 0  ;;  %v906_v50 = vunpack.c.l.b16 %v723_v45  ;;  %v650_v51 = vpack.c.bf16 %v649_v46, %v649_v46 }
  0x9c   : > { %840 = vmatpush.bf16.xpose.msra.mxu3 %v831_v49 }
  0x9d   : > { %v907_v52 = vpack.c.b16 %v906_v50, %v906_v50  ;;  %652 = vst.msk [vmem:[#allocation2] sm:$0xf] %vm651_vm3, %v650_v51 }
  0x9f   : > { %908 = vrot.lane.b32.xlu1 %v907_v52, %s1310_s25  ;;  %v930_v47 = vld [vmem:[#allocation3 + $0x8] sm:$0xff] }
  0xa4   : > { %v821_v53 = vld [vmem:[#allocation2] sm:$0xf] }
  0xa5   : > { %1194 = vmatmul.msk.bf16.vlgmr.msra.gmra.mxu3 %vm826_vm2, %v821_v53  ;;  %v901_v54 = vunpack.c.l.b16 %v821_v53 }
  0xa7   : > { %v902_v55 = vpack.c.b16 %v901_v54, %v901_v54 }
  0xa9   : > { %903 = vrot.lane.b32.xlu2 %v902_v55, %s1310_s25 }
  0xff   : > { %v739_v58 = vpop.xlane.xlu2 %738 }
 0x100   : > { %v740_v59 = vmul.f32 %v739_v58, %v733_v17 }
 0x102   : > { %v741_v60 = vmul.f32 1.032258, %v740_v59 }
 0x104   : > { %1267 = vrsqrt.f32 %v741_v60  ;;  %vm754_vm5 = vcmp.eq.f32.partialorder %v741_v60, inf  ;;  %v757_v8 = vand.u32 2147483648, %v741_v60  ;;  %vm756_vm6 = vcmp.eq.f32.partialorder %v741_v60, 0.0 }
 0x107   : > { %v904_v9 = vpop.permute.xlu2 %903 }
 0x10a   : > { %v1268_v61 = vpop.eup %1267 }
 0x10b   : > { %v748_v62 = vmul.f32 %v1268_v61, %v741_v60 }
 0x10d   : > { %v749_v63 = vmul.f32 %v1268_v61, %v748_v62 }
 0x10f   : > { %v750_v1 = vmul.f32 0.5, %v749_v63  ;;  %v846_v63 = vld [vmem:[#allocation3] sm:$0xff] }
 0x111   : > { %v909_v0 = vpop.permute.xlu1 %908  ;;  %v751_v3 = vsub.f32 1.5, %v750_v1 }
 0x112   : > { %v914_v2 = vsel %vm826_vm2, %v909_v0, 0 }
 0x113   : > { %923 = vmatpush.bf16.xpose.msrb.mxu1 %v914_v2  ;;  %v752_v6 = vmul.f32 %v1268_v61, %v751_v3 }
 0x115   : > { %v753_v7 = vmul.f32 %v752_v6, %v741_v60  ;;  %v947_v6 = vld [vmem:[#allocation4 + $0x8] sm:$0xff] }
 0x117   : > { %v755_v10 = vsel %vm754_vm5, %v741_v60, %v753_v7 }
 0x118   : > { %v758_v11 = vsel %vm756_vm6, %v757_v8, %v755_v10 }
 0x119   : > { %v759_v12 = vadd.f32 1e-06, %v758_v11 }
 0x11a   : > { %1196 = vmatmul.msk.bf16.vlgmr.msrb.gmra.mxu1 %vm826_vm2, %v904_v9 }
 0x11b   : > { %1269 = vrcp.f32 %v759_v12  ;;  %v771_v16 = vand.u32 2147483648, %v759_v12  ;;  %v769_v20 = vand.u32 2147483647, %v759_v12  ;;  %vm765_vm8 = vweird.f32 %v759_v12 }
 0x11d   : > { %v772_v23 = vor.u32 1.1754944e-38, %v771_v16  ;;  %vm770_vm10 = vcmp.eq.f32.partialorder %v769_v20, 8.507059e+37 }
 0x121   : > { %v1270_v13 = vpop.eup %1269 }
 0x122   : > { %v761_v14 = vmul.f32 %v1270_v13, %v759_v12  ;;  %vm766_vm7 = vweird.f32 %v1270_v13 }
 0x123   : > { %vm767_vm9 = vmor %vm765_vm8, %vm766_vm7 }
 0x124   : > { %v762_v15 = vsub.f32 1.0, %v761_v14 }
 0x126   : > { %v763_v19 = vmul.f32 %v1270_v13, %v762_v15 }
 0x128   : > { %v842_v17 = vpop.f32.mrf.mxu3  ;;  %v764_v21 = vadd.f32 %v1270_v13, %v763_v19 }
 0x129   : > { %v843_v52 = vadd.f32 %v842_v17, %v824_v33 }
 0x12a   : > { %v768_v25 = vsel %vm767_vm9, %v1270_v13, %v764_v21 }
 0x12b   : > { %v773_v27 = vsel %vm770_vm10, %v772_v23, %v768_v25  ;;  %v848_v53 = vsel %vm847_vm12, %v843_v52, -inf  ;;  %v822_v23 = vld [vmem:[#allocation5] sm:$0xff] }
 0x12c   : > { %v774_v28 = vmul.f32 %v773_v27, %v746_v24 }
 0x12e   : > { %v779_v30 = vadd.f32 %v1262_v26, %v774_v28 }
 0x130   : > { %v844_v29 = vpop.f32.mrf.mxu3  ;;  %v780_v31 = vpack.c.bf16 %v779_v30, %v779_v30 }
 0x132   : > { %1193 = vmatmul.msk.bf16.vlgmr.msra.gmra.mxu2 %vm619_vm0, %v780_v31 }
 0x197   : > { %v925_v34 = vpop.f32.mrf.mxu1 }
 0x198   : > { %v926_v35 = vadd.f32 %v925_v34, %v824_v33 }
 0x19a   : > { %v931_v36 = vsel %vm847_vm12, %v926_v35, -inf }
 0x19b   : > { %932 = vmax.xlane.f32.xlu0 %v931_v36 }
 0x19f   : > { %v927_v37 = vpop.f32.mrf.mxu1 }
 0x1a0   : > { %v1216_v37 = vld [vmem:[%s1559_s12 + $0x8] sm:$0xff] }
 0x1a1   : > { %1046 = vmatpush.bf16.msrb.mxu3 %v1216_v37 }
 0x1a5   : > { %1047 = vmatpush.bf16.msrb.mxu3 %v1215_v38 }
 0x1b5   : > { %v813_v40 = vpop.f32.mrf.mxu2 }
 0x1b6   : > { %v814_v41 = vadd.f32 %v1263_v39, %v813_v40 }
 0x1b8   : > { %v817_v42 = vpack.c.bf16 %v814_v41, %v814_v41 }
 0x1ba   : > { %v957_v43 = vunpack.c.l.b16 %v817_v42  ;;  %v878_v44 = vsel %vm876_vm13, %v817_v42, 0 }
 0x1bb   : > { %887 = vmatpush.bf16.msrb.mxu0 %v878_v44 }
 0x1bc   : > { %v958_v45 = vpack.c.b16 %v957_v43, %v957_v43 }
 0x1bd   : > { %v815_v46 = vpop.f32.mrf.mxu2 }
 0x1be   : > { %959 = vrot.lane.b32.xlu2 %v958_v45, %s1310_s25  ;;  %v1264_v46 = vld [vmem:[%s1560_s13] ss:$0 sm:$0xff] }
 0x20e   : > { %v933_v48 = vpop.xlane.xlu0 %932 }
 0x20f   : > { %v934_v49 = vmax.f32 %v930_v47, %v933_v48 }
 0x211   : > { %954 = vst.msk [vmem:[#allocation3 + $0x8] sm:$0xff] %vm653_vm4, %v934_v49  ;;  %940 = vperm.xlu1 %1252, %v934_v49   ;;  %v935_v54 = vsub.f32 %v930_v47, %v934_v49  ;;  %v1020_v47 = vadd.f32 %v1264_v46, %v1439_v5 }
 0x213   : > { %v936_v55 = vmul.f32 1.442695, %v935_v54 }
 0x215   : > { %1271 = vpow2.f32 %v936_v55 }
 0x218   : > { %v960_v50 = vpop.permute.xlu2 %959 }
 0x219   : > { %v965_v51 = vsel %vm876_vm13, %v960_v50, 0 }
 0x21a   : > { %974 = vmatpush.bf16.msrb.mxu2 %v965_v51 }
 0x21b   : > { %v1272_v56 = vpop.eup %1271 }
 0x21c   : > { %v948_v7 = vmul.f32 %v1272_v56, %v947_v6 }
 0x23b   : > { %849 = vmax.xlane.f32.xlu1 %v848_v53 }
 0x254   : > { %982 = vperm.xlu1 %1252, %v1272_v56  }
 0x283   : > { %v941_v57 = vpop.permute.xlu1 %940 }
 0x284   : > { %v943_v58 = vsub.f32 %v926_v35, %v941_v57 }
 0x286   : > { %v944_v59 = vmul.f32 1.442695, %v943_v58 }
 0x288   : > { %1273 = vpow2.f32 %v944_v59 }
 0x28e   : > { %v1274_v60 = vpop.eup %1273 }
 0x28f   : > { %v949_v61 = vsel %vm847_vm12, %v1274_v60, 0.0  ;;  %v955_v62 = vpack.c.bf16 %v1274_v60, %v1274_v60 }
 0x290   : > { %950 = vadd.xlane.f32.xlu0 %v949_v61 }
 0x291   : > { %1197 = vmatmul.msk.bf16.vlgmr.msrb.gmra.mxu2 %vm847_vm12, %v955_v62 }
 0x2ae   : > { %v850_v0 = vpop.xlane.xlu1 %849 }
 0x2af   : > { %v851_v1 = vmax.f32 %v846_v63, %v850_v0 }
 0x2b1   : > { %v852_v2 = vsub.f32 %v846_v63, %v851_v1  ;;  %871 = vst.msk [vmem:[#allocation3] sm:$0xff] %vm653_vm4, %v851_v1  ;;  %857 = vperm.xlu2 %1253, %v851_v1  }
 0x2b3   : > { %v853_v3 = vmul.f32 1.442695, %v852_v2 }
 0x2b5   : > { %1275 = vpow2.f32 %v853_v3 }
 0x2bb   : > { %v1276_v4 = vpop.eup %1275 }
 0x2bc   : > { %895 = vperm.xlu0 %1254, %v1276_v4   ;;  %v864_v19 = vmul.f32 %v1276_v4, %v863_v18 }
 0x2c6   : > { %v983_v24 = vpop.permute.xlu1 %982 }
 0x2c7   : > { %v985_v27 = vmul.f32 %v983_v24, %v822_v23 }
 0x303   : > { %v951_v8 = vpop.xlane.xlu0 %950 }
 0x304   : > { %v952_v9 = vadd.f32 %v951_v8, %v948_v7 }
 0x306   : > { %953 = vst.msk [vmem:[#allocation4 + $0x8] sm:$0xff] %vm653_vm4, %v952_v9 }
 0x30b   : > { %v858_v10 = vpop.permute.xlu2 %857 }
 0x30c   : > { %v860_v11 = vsub.f32 %v843_v52, %v858_v10 }
 0x30d   : > { %v1005_v33 = vld [vmem:[#allocation4 + $0x8] sm:$0xff] }
 0x30e   : > { %v861_v12 = vmul.f32 1.442695, %v860_v11 }
 0x310   : > { %1277 = vpow2.f32 %v861_v12 }
 0x314   : > { %v976_v13 = vpop.f32.mrf.mxu2 }
 0x316   : > { %v1278_v14 = vpop.eup %1277 }
 0x317   : > { %v865_v15 = vsel %vm847_vm12, %v1278_v14, 0.0  ;;  %v872_v16 = vpack.c.bf16 %v1278_v14, %v1278_v14 }
 0x318   : > { %866 = vadd.xlane.f32.xlu2 %v865_v15 }
 0x319   : > { %1195 = vmatmul.msk.bf16.vlgmr.msrb.gmra.mxu0 %vm847_vm12, %v872_v16 }
 0x31c   : > { %v978_v17 = vpop.f32.mrf.mxu2 }
 0x32e   : > { %v896_v25 = vpop.permute.xlu0 %895 }
 0x32f   : > { %v898_v28 = vmul.f32 %v896_v25, %v822_v23 }
 0x330   : > { %987 = vrot.lane.b32.xlu2 %v976_v13, %s1313_s21 }
 0x38b   : > { %v867_v20 = vpop.xlane.xlu2 %866 }
 0x38c   : > { %v868_v21 = vadd.f32 %v867_v20, %v864_v19 }
 0x38e   : > { %870 = vst.msk [vmem:[#allocation4] sm:$0xff] %vm653_vm4, %v868_v21 }
 0x393   : > { %v988_v26 = vpop.permute.xlu2 %987 }
 0x394   : > { %v990_v31 = vadd.f32 %v988_v26, %v985_v27 }
 0x395   : > { %v997_v29 = vld [vmem:[#allocation4] sm:$0xff] }
 0x396   : > { %v889_v30 = vpop.f32.mrf.mxu0  ;;  %1279 = vrcp.f32 %v997_v29 }
 0x397   : > { %v899_v32 = vadd.f32 %v898_v28, %v889_v30  ;;  %1281 = vrcp.f32 %v1005_v33 }
 0x399   : > { %v991_v22 = vsel %vm826_vm2, %v899_v32, %v990_v31 }
 0x39a   : > { %992 = vst.msk [vmem:[#allocation5] sm:$0xff] %vm619_vm0, %v991_v22 }
 0x39c   : > { %v1280_v34 = vpop.eup %1279 }
 0x39d   : > { %1001 = vperm.xlu1 %1252, %v1280_v34   ;;  %v1282_v36 = vpop.eup %1281 }
 0x39e   : > { %v891_v35 = vpop.f32.mrf.mxu0 }
 0x3a1   : > { %v996_v40 = vld [vmem:[#allocation5] sm:$0xff] }
 0x3a5   : > { %1009 = vperm.xlu1 %1252, %v1282_v36  }
 0x40f   : > { %v1002_v39 = vpop.permute.xlu1 %1001 }
 0x410   : > { %v1004_v42 = vmul.f32 %v1002_v39, %v996_v40 }
 0x417   : > { %v1010_v41 = vpop.permute.xlu1 %1009 }
 0x418   : > { %v1012_v43 = vmul.f32 %v1010_v41, %v996_v40 }
 0x41a   : > { %v1013_v44 = vsel %vm826_vm2, %v1004_v42, %v1012_v43 }
 0x41b   : > { %v1014_v45 = vpack.c.bf16 %v1013_v44, %v1013_v44 }
 0x41d   : > { %1206 = vmatmul.msk.bf16.vlgmr.msrb.gmra.mxu3 %vm619_vm0, %v1014_v45 }
 0x4a0   : > { %v1049_v48 = vpop.f32.mrf.mxu3 }
 0x4a1   : > { %v1053_v49 = vadd.f32 %v1049_v48, %v1020_v47 }
 0x4a3   : > { %1054 = vst.msk [vmem:[%s587_s29] sm:$0xff] %vm619_vm0, %v1053_v49 }
 0x4a8   : > { %v1051_v50 = vpop.f32.mrf.mxu3 }
 0x4a9 PF: > { %s26_s23 = sadd.s32 1, %s1305_s23   ;;  %s1566_s21 = smov %s1301_s22 }
 0x4aa   : > { %p23_p5 = scmp.ge.s32.totalorder %s26_s23, 4   ;;  %s1567_s22 = smov %s1569_s24 }
 0x4ac   :  { %25 = sbr.rel (!%p23_p5) target bundleno = 2 (0x2), region = 136 }

</bundles_post_ra>
